<compile_context>
chip_gen: v5e
topology: v5e:2x2
jax: 0.10.0
libtpu: 0.0.40
codegen_flags: <defaults>
</compile_context>

<pallas_src>
import functools

import jax
import jax.numpy as jnp
from jax.experimental import pallas as pl
from jax.experimental.pallas import tpu as pltpu


# ------------------------------- FC kernel ----------------------------------

def _fc_kernel(z_ref, w_ref, b_ref, out_ref):
    out_ref[...] = (
        jnp.dot(z_ref[...], w_ref[...], preferred_element_type=jnp.float32)
        + b_ref[...]
    )


def fc_pallas(z, w, b):
    """z: (B, Din), w: (Din, N), b: (N,) -> (B, N). Single full-block matmul."""
    B = z.shape[0]
    N = w.shape[1]
    return pl.pallas_call(
        _fc_kernel,
        out_shape=jax.ShapeDtypeStruct((B, N), jnp.float32),
    )(z, w, b.reshape(1, N))


# ------------------------ ConvTranspose1d (stride=2) -------------------------

def _make_deconv_kernel(taps_even, taps_odd, pad_left, out_rows, apply_relu):
    """taps_*: list of (k, d) s.t. y[2m+r, :] += x[m+d, :] @ W[k]."""

    def kernel(x_ref, w_ref, b_ref, out_ref):
        xp = x_ref[0]                                  # (L_pad, Cin)

        def phase(taps):
            k0, d0 = taps[0]
            s0 = d0 + pad_left
            acc = jnp.dot(xp[s0:s0 + out_rows, :], w_ref[k0],
                          preferred_element_type=jnp.float32)
            for k, d in taps[1:]:
                s = d + pad_left
                acc = acc + jnp.dot(xp[s:s + out_rows, :], w_ref[k],
                                    preferred_element_type=jnp.float32)
            return acc

        # even phase -> columns [0:Cout], odd phase -> [Cout:2*Cout]
        y = jnp.concatenate([phase(taps_even), phase(taps_odd)], axis=-1)
        y = y + b_ref[...]                             # (1, 2*Cout) broadcast
        if apply_relu:
            y = jnp.maximum(y, 0.0)
        out_ref[0] = y

    return kernel


def conv_transpose1d_pallas(x, w_kio, bias, *, padding, output_padding,
                            relu, crop_len=None):
    """PyTorch ConvTranspose1d with stride=2 in channel-last layout.

    x: (B, L, Cin); w_kio: (K, Cin, Cout)  (torch weight (Cin,Cout,K) transposed);
    bias: (Cout,). Returns (B, min(L_out, crop_len), Cout).
    """
    stride = 2
    B, L, Cin = x.shape
    K, _, Cout = w_kio.shape
    L_out = (L - 1) * stride - 2 * padding + K + output_padding
    if crop_len is not None:
        L_out = min(crop_len, L_out)
    assert L_out % 2 == 0, "even/odd phase split needs an even output length"
    M = L_out // 2

    # Output position n = 2m + r receives x[m + d] @ W[:, :, k] for every tap k
    # with (r + padding - k) even, where d = (r + padding - k) // 2.
    taps = {0: [], 1: []}
    for r in (0, 1):
        for k in range(K):
            if (r + padding - k) % 2 == 0:
                taps[r].append((k, (r + padding - k) // 2))
    all_d = [d for r in (0, 1) for (_k, d) in taps[r]]
    pad_left = max(0, -min(all_d))
    pad_right = max(0, (M - 1) + max(all_d) + 1 - L)
    x_pad = jnp.pad(x, ((0, 0), (pad_left, pad_right), (0, 0)))
    L_pad = L + pad_left + pad_right

    bias2 = jnp.concatenate([bias, bias]).reshape(1, 2 * Cout).astype(jnp.float32)

    kernel = _make_deconv_kernel(taps[0], taps[1], pad_left, M, relu)

    out = pl.pallas_call(
        kernel,
        out_shape=jax.ShapeDtypeStruct((B, M, 2 * Cout), jnp.float32),
        grid_spec=pltpu.PrefetchScalarGridSpec(
            num_scalar_prefetch=0,
            grid=(B,),
            in_specs=[
                pl.BlockSpec((1, L_pad, Cin), lambda b: (b, 0, 0)),   # activations
                pl.BlockSpec((K, Cin, Cout), lambda b: (0, 0, 0)),    # weights
                pl.BlockSpec((1, 2 * Cout), lambda b: (0, 0)),        # duplicated bias
            ],
            out_specs=pl.BlockSpec((1, M, 2 * Cout), lambda b: (b, 0, 0)),
        ),
        compiler_params=pltpu.CompilerParams(
            dimension_semantics=("parallel",)),
    )(x_pad, w_kio, bias2)

    # Row-major reshape interleaves phases: (b, m, r*Cout + c) -> (b, 2m + r, c).
    return out.reshape(B, L_out, Cout)


# ------------------------------ full forward ---------------------------------

def decoder_forward(z, params, *, hidden, base_len, crop_len):
    B = z.shape[0]
    h = fc_pallas(z, params["fc_w_perm"], params["fc_b_perm"])   # (B, base_len*hidden)
    x = h.reshape(B, base_len, hidden)        # == torch x.view(B, hidden, L0), channel-last
    x = conv_transpose1d_pallas(x, params["w1"], params["b1"],
                                padding=3, output_padding=1, relu=True)
    x = conv_transpose1d_pallas(x, params["uw1"], params["ub1"],
                                padding=0, output_padding=0, relu=False)
    x = conv_transpose1d_pallas(x, params["w2"], params["b2"],
                                padding=2, output_padding=1, relu=True)
    x = conv_transpose1d_pallas(x, params["uw2"], params["ub2"],
                                padding=0, output_padding=0, relu=False)
    x = conv_transpose1d_pallas(x, params["w3"], params["b3"],
                                padding=2, output_padding=1, relu=True,
                                crop_len=crop_len)
    return x   # (B, crop_len, out_channels) == torch output (already "transposed")


def prepare_pallas_params(raw, hidden, base_len):
    """Permute torch-layout params into the kernel layouts (layout plumbing only)."""
    latent = raw["fc_w"].shape[0]
    fc_w_perm = (raw["fc_w"].reshape(latent, hidden, base_len)
                 .transpose(0, 2, 1).reshape(latent, base_len * hidden))
    fc_b_perm = raw["fc_b"].reshape(hidden, base_len).T.reshape(-1)
    p = {"fc_w_perm": fc_w_perm, "fc_b_perm": fc_b_perm}
    for name in ("w1", "uw1", "w2", "uw2", "w3"):
        p[name] = jnp.transpose(raw[name], (2, 0, 1))   # (Cin,Cout,K) -> (K,Cin,Cout)
    for name in ("b1", "ub1", "b2", "ub2", "b3"):
        p[name] = raw[name]
    return p


# ------------------------------- reference -----------------------------------

def _conv_transpose1d_ref(x, w, b, stride, padding, output_padding):
    """PyTorch ConvTranspose1d semantics via lhs-dilated conv (x:(B,Cin,L), w:(Cin,Cout,K))."""
    K = w.shape[-1]
    y = jax.lax.conv_general_dilated(
        x, jnp.flip(w, axis=2),
        window_strides=(1,),
        padding=[(K - 1 - padding, K - 1 - padding + output_padding)],
        lhs_dilation=(stride,),
        dimension_numbers=("NCH", "IOH", "NCH"),
        precision=jax.lax.Precision.HIGHEST,
    )
    return y + b[None, :, None]


def decoder_ref(z, raw, *, hidden, base_len, crop_len):
    B = z.shape[0]
    h = jnp.dot(z, raw["fc_w"], precision=jax.lax.Precision.HIGHEST) + raw["fc_b"]
    x = h.reshape(B, hidden, base_len)
    x = jax.nn.relu(_conv_transpose1d_ref(x, raw["w1"], raw["b1"], 2, 3, 1))
    x = _conv_transpose1d_ref(x, raw["uw1"], raw["ub1"], 2, 0, 0)
    x = jax.nn.relu(_conv_transpose1d_ref(x, raw["w2"], raw["b2"], 2, 2, 1))
    x = _conv_transpose1d_ref(x, raw["uw2"], raw["ub2"], 2, 0, 0)
    x = jax.nn.relu(_conv_transpose1d_ref(x, raw["w3"], raw["b3"], 2, 2, 1))
    x = x[:, :, :crop_len]
    return jnp.transpose(x, (0, 2, 1))


# --------------------------------- main ---------------------------------------

if __name__ == "__main__":
    # Small shapes with the same structure as the module
    # (torch defaults: latent=200, hidden=220, out=130, base length 145, crop 1164).
    B, LATENT, HIDDEN, OUT_CH, BASE_LEN, CROP = 2, 32, 16, 8, 16, 128

    key = jax.random.PRNGKey(0)
    keys = jax.random.split(key, 13)
    s = 0.1
    raw = {
        "fc_w": jax.random.normal(keys[1], (LATENT, HIDDEN * BASE_LEN), jnp.float32) * s,
        "fc_b": jax.random.normal(keys[2], (HIDDEN * BASE_LEN,), jnp.float32) * s,
        "w1": jax.random.normal(keys[3], (HIDDEN, HIDDEN, 7), jnp.float32) * s,
        "b1": jax.random.normal(keys[4], (HIDDEN,), jnp.float32) * s,
        "uw1": jax.random.normal(keys[5], (HIDDEN, HIDDEN, 2), jnp.float32) * s,
        "ub1": jax.random.normal(keys[6], (HIDDEN,), jnp.float32) * s,
        "w2": jax.random.normal(keys[7], (HIDDEN, HIDDEN, 7), jnp.float32) * s,
        "b2": jax.random.normal(keys[8], (HIDDEN,), jnp.float32) * s,
        "uw2": jax.random.normal(keys[9], (HIDDEN, HIDDEN, 2), jnp.float32) * s,
        "ub2": jax.random.normal(keys[10], (HIDDEN,), jnp.float32) * s,
        "w3": jax.random.normal(keys[11], (HIDDEN, OUT_CH, 7), jnp.float32) * s,
        "b3": jax.random.normal(keys[12], (OUT_CH,), jnp.float32) * s,
    }
    z = jax.random.normal(keys[0], (B, LATENT), jnp.float32)

    pallas_params = prepare_pallas_params(raw, HIDDEN, BASE_LEN)

    fwd = jax.jit(functools.partial(decoder_forward, hidden=HIDDEN,
                                    base_len=BASE_LEN, crop_len=CROP))
    out = jax.block_until_ready(fwd(z, pallas_params))

    ref = decoder_ref(z, raw, hidden=HIDDEN, base_len=BASE_LEN, crop_len=CROP)

    assert out.shape == (B, CROP, OUT_CH), out.shape
    assert jnp.allclose(out, ref, atol=1e-4, rtol=1e-4), (
        float(jnp.max(jnp.abs(out - ref))))

    print("KERNEL_OK")
</pallas_src>

<mosaic_0001>
module attributes {stable_mosaic.version = 11 : i64} {
  func.func @_fc_kernel(%arg0: memref<2x32xf32, #tpu.memory_space<vmem>>, %arg1: memref<32x256xf32, #tpu.memory_space<vmem>>, %arg2: memref<1x256xf32, #tpu.memory_space<vmem>>, %arg3: memref<2x256xf32, #tpu.memory_space<vmem>>) attributes {dimension_semantics = [], scalar_prefetch = 0 : i64, scratch_operands = 0 : i64, tpu.core_type = #tpu.core_type<tc>} {
    %c0 = arith.constant 0 : index
    %c0_0 = arith.constant 0 : index
    %0 = vector.load %arg0[%c0, %c0_0] : memref<2x32xf32, #tpu.memory_space<vmem>>, vector<2x32xf32>
    %c0_1 = arith.constant 0 : index
    %c0_2 = arith.constant 0 : index
    %1 = vector.load %arg1[%c0_1, %c0_2] : memref<32x256xf32, #tpu.memory_space<vmem>>, vector<32x256xf32>
    %cst = arith.constant dense<0.000000e+00> : vector<2x256xf32>
    %2 = tpu.matmul %0, %1, %cst {dimension_numbers = #tpu.dot_dimension_numbers<[1], [0], [0], [1], [0, 0, 1, 1], [], []>} : vector<2x32xf32>, vector<32x256xf32>, vector<2x256xf32> -> vector<2x256xf32>
    %c0_3 = arith.constant 0 : index
    %c0_4 = arith.constant 0 : index
    %3 = vector.load %arg2[%c0_3, %c0_4] : memref<1x256xf32, #tpu.memory_space<vmem>>, vector<1x256xf32>
    %4 = vector.broadcast %3 : vector<1x256xf32> to vector<2x256xf32>
    %5 = arith.addf %2, %4 : vector<2x256xf32>
    %c0_5 = arith.constant 0 : index
    %c0_6 = arith.constant 0 : index
    %6 = vector.load %arg3[%c0_5, %c0_6] : memref<2x256xf32, #tpu.memory_space<vmem>>, vector<2x256xf32>
    tpu.vector_store %arg3[%c0_5, %c0_6], %5 {strides = array<i32>} : memref<2x256xf32, #tpu.memory_space<vmem>>, vector<2x256xf32>,
    return
  }
}

module attributes {stable_mosaic.version = 11 : i64} {
  func.func @kernel(%arg0: i32, %arg1: memref<1x32x16xf32, #tpu.memory_space<vmem>>, %arg2: memref<2x16x16xf32, #tpu.memory_space<vmem>>, %arg3: memref<1x32xf32, #tpu.memory_space<vmem>>, %arg4: memref<1x32x32xf32, #tpu.memory_space<vmem>>) attributes {dimension_semantics = [#tpu.dimension_semantics<parallel>], iteration_bounds = array<i64: 2>, scalar_prefetch = 0 : i64, scratch_operands = 0 : i64, tpu.core_type = #tpu.core_type<tc>, window_params = [{transform_indices = @transform_0, window_bounds = array<i64: 1, 32, 16>}, {pipeline_mode = #tpu.pipeline_mode<synchronous>, transform_indices = @transform_1, window_bounds = array<i64: 2, 16, 16>}, {pipeline_mode = #tpu.pipeline_mode<synchronous>, transform_indices = @transform_2, window_bounds = array<i64: 1, 32>}, {transform_indices = @transform_3, window_bounds = array<i64: 1, 32, 32>}]} {
    %c0 = arith.constant 0 : index
    %c0_0 = arith.constant 0 : index
    %c0_1 = arith.constant 0 : index
    %0 = vector.load %arg1[%c0, %c0_0, %c0_1] : memref<1x32x16xf32, #tpu.memory_space<vmem>>, vector<1x32x16xf32>
    %1 = vector.shape_cast %0 : vector<1x32x16xf32> to vector<32x16xf32>
    %c0_2 = arith.constant 0 : index
    %c0_3 = arith.constant 0 : index
    %c0_4 = arith.constant 0 : index
    %2 = vector.load %arg2[%c0_2, %c0_3, %c0_4] : memref<2x16x16xf32, #tpu.memory_space<vmem>>, vector<1x16x16xf32>
    %3 = vector.shape_cast %2 : vector<1x16x16xf32> to vector<16x16xf32>
    %cst = arith.constant dense<0.000000e+00> : vector<32x16xf32>
    %4 = tpu.matmul %1, %3, %cst {dimension_numbers = #tpu.dot_dimension_numbers<[1], [0], [0], [1], [0, 0, 1, 1], [], []>} : vector<32x16xf32>, vector<16x16xf32>, vector<32x16xf32> -> vector<32x16xf32>
    %c1 = arith.constant 1 : index
    %c0_5 = arith.constant 0 : index
    %c0_6 = arith.constant 0 : index
    %5 = vector.load %arg2[%c1, %c0_5, %c0_6] : memref<2x16x16xf32, #tpu.memory_space<vmem>>, vector<1x16x16xf32>
    %6 = vector.shape_cast %5 : vector<1x16x16xf32> to vector<16x16xf32>
    %cst_7 = arith.constant dense<0.000000e+00> : vector<32x16xf32>
    %7 = tpu.matmul %1, %6, %cst_7 {dimension_numbers = #tpu.dot_dimension_numbers<[1], [0], [0], [1], [0, 0, 1, 1], [], []>} : vector<32x16xf32>, vector<16x16xf32>, vector<32x16xf32> -> vector<32x16xf32>
    %8 = tpu.concatenate %4, %7 in 1 : vector<32x16xf32>, vector<32x16xf32> -> vector<32x32xf32>
    %c0_8 = arith.constant 0 : index
    %c0_9 = arith.constant 0 : index
    %9 = vector.load %arg3[%c0_8, %c0_9] : memref<1x32xf32, #tpu.memory_space<vmem>>, vector<1x32xf32>
    %10 = vector.broadcast %9 : vector<1x32xf32> to vector<32x32xf32>
    %11 = arith.addf %8, %10 : vector<32x32xf32>
    %c0_10 = arith.constant 0 : index
    %c0_11 = arith.constant 0 : index
    %c0_12 = arith.constant 0 : index
    %12 = vector.load %arg4[%c0_10, %c0_11, %c0_12] : memref<1x32x32xf32, #tpu.memory_space<vmem>>, vector<1x32x32xf32>
    %13 = vector.shape_cast %12 : vector<1x32x32xf32> to vector<32x32xf32>
    %14 = vector.shape_cast %11 : vector<32x32xf32> to vector<1x32x32xf32>
    tpu.vector_store %arg4[%c0_10, %c0_11, %c0_12], %14 {strides = array<i32>} : memref<1x32x32xf32, #tpu.memory_space<vmem>>, vector<1x32x32xf32>,
    return
  }
  func.func @transform_0(%arg0: i32) -> (i32, i32, i32) {
    %c0_i32 = arith.constant 0 : i32
    %c0_i32_0 = arith.constant 0 : i32
    %c0_i32_1 = arith.constant 0 : i32
    return %arg0, %c0_i32, %c0_i32_0 : i32, i32, i32
  }
  func.func @transform_1(%arg0: i32) -> (i32, i32, i32) {
    %c0_i32 = arith.constant 0 : i32
    %c0_i32_0 = arith.constant 0 : i32
    %c0_i32_1 = arith.constant 0 : i32
    %c0_i32_2 = arith.constant 0 : i32
    return %c0_i32, %c0_i32_0, %c0_i32_1 : i32, i32, i32
  }
  func.func @transform_2(%arg0: i32) -> (i32, i32) {
    %c0_i32 = arith.constant 0 : i32
    %c0_i32_0 = arith.constant 0 : i32
    %c0_i32_1 = arith.constant 0 : i32
    return %c0_i32, %c0_i32_0 : i32, i32
  }
  func.func @transform_3(%arg0: i32) -> (i32, i32, i32) {
    %c0_i32 = arith.constant 0 : i32
    %c0_i32_0 = arith.constant 0 : i32
    %c0_i32_1 = arith.constant 0 : i32
    return %arg0, %c0_i32, %c0_i32_0 : i32, i32, i32
  }
}

module attributes {stable_mosaic.version = 11 : i64} {
  func.func @kernel(%arg0: i32, %arg1: memref<1x19x16xf32, #tpu.memory_space<vmem>>, %arg2: memref<7x16x16xf32, #tpu.memory_space<vmem>>, %arg3: memref<1x32xf32, #tpu.memory_space<vmem>>, %arg4: memref<1x16x32xf32, #tpu.memory_space<vmem>>) attributes {dimension_semantics = [#tpu.dimension_semantics<parallel>], iteration_bounds = array<i64: 2>, scalar_prefetch = 0 : i64, scratch_operands = 0 : i64, tpu.core_type = #tpu.core_type<tc>, window_params = [{transform_indices = @transform_0, window_bounds = array<i64: 1, 19, 16>}, {pipeline_mode = #tpu.pipeline_mode<synchronous>, transform_indices = @transform_1, window_bounds = array<i64: 7, 16, 16>}, {pipeline_mode = #tpu.pipeline_mode<synchronous>, transform_indices = @transform_2, window_bounds = array<i64: 1, 32>}, {transform_indices = @transform_3, window_bounds = array<i64: 1, 16, 32>}]} {
    %c0 = arith.constant 0 : index
    %c0_0 = arith.constant 0 : index
    %c0_1 = arith.constant 0 : index
    %0 = vector.load %arg1[%c0, %c0_0, %c0_1] : memref<1x19x16xf32, #tpu.memory_space<vmem>>, vector<1x19x16xf32>
    %1 = vector.shape_cast %0 : vector<1x19x16xf32> to vector<19x16xf32>
    %2 = vector.extract_strided_slice %1 {offsets = [2, 0], sizes = [16, 16], strides = [1, 1]} : vector<19x16xf32> to vector<16x16xf32>
    %c1 = arith.constant 1 : index
    %c0_2 = arith.constant 0 : index
    %c0_3 = arith.constant 0 : index
    %3 = vector.load %arg2[%c1, %c0_2, %c0_3] : memref<7x16x16xf32, #tpu.memory_space<vmem>>, vector<1x16x16xf32>
    %4 = vector.shape_cast %3 : vector<1x16x16xf32> to vector<16x16xf32>
    %cst = arith.constant dense<0.000000e+00> : vector<16x16xf32>
    %5 = tpu.matmul %2, %4, %cst {dimension_numbers = #tpu.dot_dimension_numbers<[1], [0], [0], [1], [0, 0, 1, 1], [], []>} : vector<16x16xf32>, vector<16x16xf32>, vector<16x16xf32> -> vector<16x16xf32>
    %6 = vector.extract_strided_slice %1 {offsets = [1, 0], sizes = [16, 16], strides = [1, 1]} : vector<19x16xf32> to vector<16x16xf32>
    %c3 = arith.constant 3 : index
    %c0_4 = arith.constant 0 : index
    %c0_5 = arith.constant 0 : index
    %7 = vector.load %arg2[%c3, %c0_4, %c0_5] : memref<7x16x16xf32, #tpu.memory_space<vmem>>, vector<1x16x16xf32>
    %8 = vector.shape_cast %7 : vector<1x16x16xf32> to vector<16x16xf32>
    %cst_6 = arith.constant dense<0.000000e+00> : vector<16x16xf32>
    %9 = tpu.matmul %6, %8, %cst_6 {dimension_numbers = #tpu.dot_dimension_numbers<[1], [0], [0], [1], [0, 0, 1, 1], [], []>} : vector<16x16xf32>, vector<16x16xf32>, vector<16x16xf32> -> vector<16x16xf32>
    %10 = arith.addf %5, %9 : vector<16x16xf32>
    %11 = vector.extract_strided_slice %1 {offsets = [0, 0], sizes = [16, 16], strides = [1, 1]} : vector<19x16xf32> to vector<16x16xf32>
    %c5 = arith.constant 5 : index
    %c0_7 = arith.constant 0 : index
    %c0_8 = arith.constant 0 : index
    %12 = vector.load %arg2[%c5, %c0_7, %c0_8] : memref<7x16x16xf32, #tpu.memory_space<vmem>>, vector<1x16x16xf32>
    %13 = vector.shape_cast %12 : vector<1x16x16xf32> to vector<16x16xf32>
    %cst_9 = arith.constant dense<0.000000e+00> : vector<16x16xf32>
    %14 = tpu.matmul %11, %13, %cst_9 {dimension_numbers = #tpu.dot_dimension_numbers<[1], [0], [0], [1], [0, 0, 1, 1], [], []>} : vector<16x16xf32>, vector<16x16xf32>, vector<16x16xf32> -> vector<16x16xf32>
    %15 = arith.addf %10, %14 : vector<16x16xf32>
    %16 = vector.extract_strided_slice %1 {offsets = [3, 0], sizes = [16, 16], strides = [1, 1]} : vector<19x16xf32> to vector<16x16xf32>
    %c0_10 = arith.constant 0 : index
    %c0_11 = arith.constant 0 : index
    %c0_12 = arith.constant 0 : index
    %17 = vector.load %arg2[%c0_10, %c0_11, %c0_12] : memref<7x16x16xf32, #tpu.memory_space<vmem>>, vector<1x16x16xf32>
    %18 = vector.shape_cast %17 : vector<1x16x16xf32> to vector<16x16xf32>
    %cst_13 = arith.constant dense<0.000000e+00> : vector<16x16xf32>
    %19 = tpu.matmul %16, %18, %cst_13 {dimension_numbers = #tpu.dot_dimension_numbers<[1], [0], [0], [1], [0, 0, 1, 1], [], []>} : vector<16x16xf32>, vector<16x16xf32>, vector<16x16xf32> -> vector<16x16xf32>
    %20 = vector.extract_strided_slice %1 {offsets = [2, 0], sizes = [16, 16], strides = [1, 1]} : vector<19x16xf32> to vector<16x16xf32>
    %c2 = arith.constant 2 : index
    %c0_14 = arith.constant 0 : index
    %c0_15 = arith.constant 0 : index
    %21 = vector.load %arg2[%c2, %c0_14, %c0_15] : memref<7x16x16xf32, #tpu.memory_space<vmem>>, vector<1x16x16xf32>
    %22 = vector.shape_cast %21 : vector<1x16x16xf32> to vector<16x16xf32>
    %cst_16 = arith.constant dense<0.000000e+00> : vector<16x16xf32>
    %23 = tpu.matmul %20, %22, %cst_16 {dimension_numbers = #tpu.dot_dimension_numbers<[1], [0], [0], [1], [0, 0, 1, 1], [], []>} : vector<16x16xf32>, vector<16x16xf32>, vector<16x16xf32> -> vector<16x16xf32>
    %24 = arith.addf %19, %23 : vector<16x16xf32>
    %25 = vector.extract_strided_slice %1 {offsets = [1, 0], sizes = [16, 16], strides = [1, 1]} : vector<19x16xf32> to vector<16x16xf32>
    %c4 = arith.constant 4 : index
    %c0_17 = arith.constant 0 : index
    %c0_18 = arith.constant 0 : index
    %26 = vector.load %arg2[%c4, %c0_17, %c0_18] : memref<7x16x16xf32, #tpu.memory_space<vmem>>, vector<1x16x16xf32>
    %27 = vector.shape_cast %26 : vector<1x16x16xf32> to vector<16x16xf32>
    %cst_19 = arith.constant dense<0.000000e+00> : vector<16x16xf32>
    %28 = tpu.matmul %25, %27, %cst_19 {dimension_numbers = #tpu.dot_dimension_numbers<[1], [0], [0], [1], [0, 0, 1, 1], [], []>} : vector<16x16xf32>, vector<16x16xf32>, vector<16x16xf32> -> vector<16x16xf32>
    %29 = arith.addf %24, %28 : vector<16x16xf32>
    %30 = vector.extract_strided_slice %1 {offsets = [0, 0], sizes = [16, 16], strides = [1, 1]} : vector<19x16xf32> to vector<16x16xf32>
    %c6 = arith.constant 6 : index
    %c0_20 = arith.constant 0 : index
    %c0_21 = arith.constant 0 : index
    %31 = vector.load %arg2[%c6, %c0_20, %c0_21] : memref<7x16x16xf32, #tpu.memory_space<vmem>>, vector<1x16x16xf32>
    %32 = vector.shape_cast %31 : vector<1x16x16xf32> to vector<16x16xf32>
    %cst_22 = arith.constant dense<0.000000e+00> : vector<16x16xf32>
    %33 = tpu.matmul %30, %32, %cst_22 {dimension_numbers = #tpu.dot_dimension_numbers<[1], [0], [0], [1], [0, 0, 1, 1], [], []>} : vector<16x16xf32>, vector<16x16xf32>, vector<16x16xf32> -> vector<16x16xf32>
    %34 = arith.addf %29, %33 : vector<16x16xf32>
    %35 = tpu.concatenate %15, %34 in 1 : vector<16x16xf32>, vector<16x16xf32> -> vector<16x32xf32>
    %c0_23 = arith.constant 0 : index
    %c0_24 = arith.constant 0 : index
    %36 = vector.load %arg3[%c0_23, %c0_24] : memref<1x32xf32, #tpu.memory_space<vmem>>, vector<1x32xf32>
    %37 = vector.broadcast %36 : vector<1x32xf32> to vector<16x32xf32>
    %38 = arith.addf %35, %37 : vector<16x32xf32>
    %cst_25 = arith.constant 0.000000e+00 : f32
    %39 = vector.broadcast %cst_25 : f32 to vector<16x32xf32>
    %40 = arith.maximumf %38, %39 : vector<16x32xf32>
    %c0_26 = arith.constant 0 : index
    %c0_27 = arith.constant 0 : index
    %c0_28 = arith.constant 0 : index
    %41 = vector.load %arg4[%c0_26, %c0_27, %c0_28] : memref<1x16x32xf32, #tpu.memory_space<vmem>>, vector<1x16x32xf32>
    %42 = vector.shape_cast %41 : vector<1x16x32xf32> to vector<16x32xf32>
    %43 = vector.shape_cast %40 : vector<16x32xf32> to vector<1x16x32xf32>
    tpu.vector_store %arg4[%c0_26, %c0_27, %c0_28], %43 {strides = array<i32>} : memref<1x16x32xf32, #tpu.memory_space<vmem>>, vector<1x16x32xf32>,
    return
  }
  func.func @transform_0(%arg0: i32) -> (i32, i32, i32) {
    %c0_i32 = arith.constant 0 : i32
    %c0_i32_0 = arith.constant 0 : i32
    %c0_i32_1 = arith.constant 0 : i32
    return %arg0, %c0_i32, %c0_i32_0 : i32, i32, i32
  }
  func.func @transform_1(%arg0: i32) -> (i32, i32, i32) {
    %c0_i32 = arith.constant 0 : i32
    %c0_i32_0 = arith.constant 0 : i32
    %c0_i32_1 = arith.constant 0 : i32
    %c0_i32_2 = arith.constant 0 : i32
    return %c0_i32, %c0_i32_0, %c0_i32_1 : i32, i32, i32
  }
  func.func @transform_2(%arg0: i32) -> (i32, i32) {
    %c0_i32 = arith.constant 0 : i32
    %c0_i32_0 = arith.constant 0 : i32
    %c0_i32_1 = arith.constant 0 : i32
    return %c0_i32, %c0_i32_0 : i32, i32
  }
  func.func @transform_3(%arg0: i32) -> (i32, i32, i32) {
    %c0_i32 = arith.constant 0 : i32
    %c0_i32_0 = arith.constant 0 : i32
    %c0_i32_1 = arith.constant 0 : i32
    return %arg0, %c0_i32, %c0_i32_0 : i32, i32, i32
  }
}

module attributes {stable_mosaic.version = 11 : i64} {
  func.func @kernel(%arg0: i32, %arg1: memref<1x68x16xf32, #tpu.memory_space<vmem>>, %arg2: memref<7x16x16xf32, #tpu.memory_space<vmem>>, %arg3: memref<1x32xf32, #tpu.memory_space<vmem>>, %arg4: memref<1x65x32xf32, #tpu.memory_space<vmem>>) attributes {dimension_semantics = [#tpu.dimension_semantics<parallel>], iteration_bounds = array<i64: 2>, scalar_prefetch = 0 : i64, scratch_operands = 0 : i64, tpu.core_type = #tpu.core_type<tc>, window_params = [{transform_indices = @transform_0, window_bounds = array<i64: 1, 68, 16>}, {pipeline_mode = #tpu.pipeline_mode<synchronous>, transform_indices = @transform_1, window_bounds = array<i64: 7, 16, 16>}, {pipeline_mode = #tpu.pipeline_mode<synchronous>, transform_indices = @transform_2, window_bounds = array<i64: 1, 32>}, {transform_indices = @transform_3, window_bounds = array<i64: 1, 65, 32>}]} {
    %c0 = arith.constant 0 : index
    %c0_0 = arith.constant 0 : index
    %c0_1 = arith.constant 0 : index
    %0 = vector.load %arg1[%c0, %c0_0, %c0_1] : memref<1x68x16xf32, #tpu.memory_space<vmem>>, vector<1x68x16xf32>
    %1 = vector.shape_cast %0 : vector<1x68x16xf32> to vector<68x16xf32>
    %2 = vector.extract_strided_slice %1 {offsets = [3, 0], sizes = [65, 16], strides = [1, 1]} : vector<68x16xf32> to vector<65x16xf32>
    %c0_2 = arith.constant 0 : index
    %c0_3 = arith.constant 0 : index
    %c0_4 = arith.constant 0 : index
    %3 = vector.load %arg2[%c0_2, %c0_3, %c0_4] : memref<7x16x16xf32, #tpu.memory_space<vmem>>, vector<1x16x16xf32>
    %4 = vector.shape_cast %3 : vector<1x16x16xf32> to vector<16x16xf32>
    %cst = arith.constant dense<0.000000e+00> : vector<65x16xf32>
    %5 = tpu.matmul %2, %4, %cst {dimension_numbers = #tpu.dot_dimension_numbers<[1], [0], [0], [1], [0, 0, 1, 1], [], []>} : vector<65x16xf32>, vector<16x16xf32>, vector<65x16xf32> -> vector<65x16xf32>
    %6 = vector.extract_strided_slice %1 {offsets = [2, 0], sizes = [65, 16], strides = [1, 1]} : vector<68x16xf32> to vector<65x16xf32>
    %c2 = arith.constant 2 : index
    %c0_5 = arith.constant 0 : index
    %c0_6 = arith.constant 0 : index
    %7 = vector.load %arg2[%c2, %c0_5, %c0_6] : memref<7x16x16xf32, #tpu.memory_space<vmem>>, vector<1x16x16xf32>
    %8 = vector.shape_cast %7 : vector<1x16x16xf32> to vector<16x16xf32>
    %cst_7 = arith.constant dense<0.000000e+00> : vector<65x16xf32>
    %9 = tpu.matmul %6, %8, %cst_7 {dimension_numbers = #tpu.dot_dimension_numbers<[1], [0], [0], [1], [0, 0, 1, 1], [], []>} : vector<65x16xf32>, vector<16x16xf32>, vector<65x16xf32> -> vector<65x16xf32>
    %10 = arith.addf %5, %9 : vector<65x16xf32>
    %11 = vector.extract_strided_slice %1 {offsets = [1, 0], sizes = [65, 16], strides = [1, 1]} : vector<68x16xf32> to vector<65x16xf32>
    %c4 = arith.constant 4 : index
    %c0_8 = arith.constant 0 : index
    %c0_9 = arith.constant 0 : index
    %12 = vector.load %arg2[%c4, %c0_8, %c0_9] : memref<7x16x16xf32, #tpu.memory_space<vmem>>, vector<1x16x16xf32>
    %13 = vector.shape_cast %12 : vector<1x16x16xf32> to vector<16x16xf32>
    %cst_10 = arith.constant dense<0.000000e+00> : vector<65x16xf32>
    %14 = tpu.matmul %11, %13, %cst_10 {dimension_numbers = #tpu.dot_dimension_numbers<[1], [0], [0], [1], [0, 0, 1, 1], [], []>} : vector<65x16xf32>, vector<16x16xf32>, vector<65x16xf32> -> vector<65x16xf32>
    %15 = arith.addf %10, %14 : vector<65x16xf32>
    %16 = vector.extract_strided_slice %1 {offsets = [0, 0], sizes = [65, 16], strides = [1, 1]} : vector<68x16xf32> to vector<65x16xf32>
    %c6 = arith.constant 6 : index
    %c0_11 = arith.constant 0 : index
    %c0_12 = arith.constant 0 : index
    %17 = vector.load %arg2[%c6, %c0_11, %c0_12] : memref<7x16x16xf32, #tpu.memory_space<vmem>>, vector<1x16x16xf32>
    %18 = vector.shape_cast %17 : vector<1x16x16xf32> to vector<16x16xf32>
    %cst_13 = arith.constant dense<0.000000e+00> : vector<65x16xf32>
    %19 = tpu.matmul %16, %18, %cst_13 {dimension_numbers = #tpu.dot_dimension_numbers<[1], [0], [0], [1], [0, 0, 1, 1], [], []>} : vector<65x16xf32>, vector<16x16xf32>, vector<65x16xf32> -> vector<65x16xf32>
    %20 = arith.addf %15, %19 : vector<65x16xf32>
    %21 = vector.extract_strided_slice %1 {offsets = [3, 0], sizes = [65, 16], strides = [1, 1]} : vector<68x16xf32> to vector<65x16xf32>
    %c1 = arith.constant 1 : index
    %c0_14 = arith.constant 0 : index
    %c0_15 = arith.constant 0 : index
    %22 = vector.load %arg2[%c1, %c0_14, %c0_15] : memref<7x16x16xf32, #tpu.memory_space<vmem>>, vector<1x16x16xf32>
    %23 = vector.shape_cast %22 : vector<1x16x16xf32> to vector<16x16xf32>
    %cst_16 = arith.constant dense<0.000000e+00> : vector<65x16xf32>
    %24 = tpu.matmul %21, %23, %cst_16 {dimension_numbers = #tpu.dot_dimension_numbers<[1], [0], [0], [1], [0, 0, 1, 1], [], []>} : vector<65x16xf32>, vector<16x16xf32>, vector<65x16xf32> -> vector<65x16xf32>
    %25 = vector.extract_strided_slice %1 {offsets = [2, 0], sizes = [65, 16], strides = [1, 1]} : vector<68x16xf32> to vector<65x16xf32>
    %c3 = arith.constant 3 : index
    %c0_17 = arith.constant 0 : index
    %c0_18 = arith.constant 0 : index
    %26 = vector.load %arg2[%c3, %c0_17, %c0_18] : memref<7x16x16xf32, #tpu.memory_space<vmem>>, vector<1x16x16xf32>
    %27 = vector.shape_cast %26 : vector<1x16x16xf32> to vector<16x16xf32>
    %cst_19 = arith.constant dense<0.000000e+00> : vector<65x16xf32>
    %28 = tpu.matmul %25, %27, %cst_19 {dimension_numbers = #tpu.dot_dimension_numbers<[1], [0], [0], [1], [0, 0, 1, 1], [], []>} : vector<65x16xf32>, vector<16x16xf32>, vector<65x16xf32> -> vector<65x16xf32>
    %29 = arith.addf %24, %28 : vector<65x16xf32>
    %30 = vector.extract_strided_slice %1 {offsets = [1, 0], sizes = [65, 16], strides = [1, 1]} : vector<68x16xf32> to vector<65x16xf32>
    %c5 = arith.constant 5 : index
    %c0_20 = arith.constant 0 : index
    %c0_21 = arith.constant 0 : index
    %31 = vector.load %arg2[%c5, %c0_20, %c0_21] : memref<7x16x16xf32, #tpu.memory_space<vmem>>, vector<1x16x16xf32>
    %32 = vector.shape_cast %31 : vector<1x16x16xf32> to vector<16x16xf32>
    %cst_22 = arith.constant dense<0.000000e+00> : vector<65x16xf32>
    %33 = tpu.matmul %30, %32, %cst_22 {dimension_numbers = #tpu.dot_dimension_numbers<[1], [0], [0], [1], [0, 0, 1, 1], [], []>} : vector<65x16xf32>, vector<16x16xf32>, vector<65x16xf32> -> vector<65x16xf32>
    %34 = arith.addf %29, %33 : vector<65x16xf32>
    %35 = tpu.concatenate %20, %34 in 1 : vector<65x16xf32>, vector<65x16xf32> -> vector<65x32xf32>
    %c0_23 = arith.constant 0 : index
    %c0_24 = arith.constant 0 : index
    %36 = vector.load %arg3[%c0_23, %c0_24] : memref<1x32xf32, #tpu.memory_space<vmem>>, vector<1x32xf32>
    %37 = vector.broadcast %36 : vector<1x32xf32> to vector<65x32xf32>
    %38 = arith.addf %35, %37 : vector<65x32xf32>
    %cst_25 = arith.constant 0.000000e+00 : f32
    %39 = vector.broadcast %cst_25 : f32 to vector<65x32xf32>
    %40 = arith.maximumf %38, %39 : vector<65x32xf32>
    %c0_26 = arith.constant 0 : index
    %c0_27 = arith.constant 0 : index
    %c0_28 = arith.constant 0 : index
    %41 = vector.load %arg4[%c0_26, %c0_27, %c0_28] : memref<1x65x32xf32, #tpu.memory_space<vmem>>, vector<1x65x32xf32>
    %42 = vector.shape_cast %41 : vector<1x65x32xf32> to vector<65x32xf32>
    %43 = vector.shape_cast %40 : vector<65x32xf32> to vector<1x65x32xf32>
    tpu.vector_store %arg4[%c0_26, %c0_27, %c0_28], %43 {strides = array<i32>} : memref<1x65x32xf32, #tpu.memory_space<vmem>>, vector<1x65x32xf32>,
    return
  }
  func.func @transform_0(%arg0: i32) -> (i32, i32, i32) {
    %c0_i32 = arith.constant 0 : i32
    %c0_i32_0 = arith.constant 0 : i32
    %c0_i32_1 = arith.constant 0 : i32
    return %arg0, %c0_i32, %c0_i32_0 : i32, i32, i32
  }
  func.func @transform_1(%arg0: i32) -> (i32, i32, i32) {
    %c0_i32 = arith.constant 0 : i32
    %c0_i32_0 = arith.constant 0 : i32
    %c0_i32_1 = arith.constant 0 : i32
    %c0_i32_2 = arith.constant 0 : i32
    return %c0_i32, %c0_i32_0, %c0_i32_1 : i32, i32, i32
  }
  func.func @transform_2(%arg0: i32) -> (i32, i32) {
    %c0_i32 = arith.constant 0 : i32
    %c0_i32_0 = arith.constant 0 : i32
    %c0_i32_1 = arith.constant 0 : i32
    return %c0_i32, %c0_i32_0 : i32, i32
  }
  func.func @transform_3(%arg0: i32) -> (i32, i32, i32) {
    %c0_i32 = arith.constant 0 : i32
    %c0_i32_0 = arith.constant 0 : i32
    %c0_i32_1 = arith.constant 0 : i32
    return %arg0, %c0_i32, %c0_i32_0 : i32, i32, i32
  }
}

module attributes {stable_mosaic.version = 11 : i64} {
  func.func @kernel(%arg0: i32, %arg1: memref<1x130x16xf32, #tpu.memory_space<vmem>>, %arg2: memref<2x16x16xf32, #tpu.memory_space<vmem>>, %arg3: memref<1x32xf32, #tpu.memory_space<vmem>>, %arg4: memref<1x130x32xf32, #tpu.memory_space<vmem>>) attributes {dimension_semantics = [#tpu.dimension_semantics<parallel>], iteration_bounds = array<i64: 2>, scalar_prefetch = 0 : i64, scratch_operands = 0 : i64, tpu.core_type = #tpu.core_type<tc>, window_params = [{transform_indices = @transform_0, window_bounds = array<i64: 1, 130, 16>}, {pipeline_mode = #tpu.pipeline_mode<synchronous>, transform_indices = @transform_1, window_bounds = array<i64: 2, 16, 16>}, {pipeline_mode = #tpu.pipeline_mode<synchronous>, transform_indices = @transform_2, window_bounds = array<i64: 1, 32>}, {transform_indices = @transform_3, window_bounds = array<i64: 1, 130, 32>}]} {
    %c0 = arith.constant 0 : index
    %c0_0 = arith.constant 0 : index
    %c0_1 = arith.constant 0 : index
    %0 = vector.load %arg1[%c0, %c0_0, %c0_1] : memref<1x130x16xf32, #tpu.memory_space<vmem>>, vector<1x130x16xf32>
    %1 = vector.shape_cast %0 : vector<1x130x16xf32> to vector<130x16xf32>
    %c0_2 = arith.constant 0 : index
    %c0_3 = arith.constant 0 : index
    %c0_4 = arith.constant 0 : index
    %2 = vector.load %arg2[%c0_2, %c0_3, %c0_4] : memref<2x16x16xf32, #tpu.memory_space<vmem>>, vector<1x16x16xf32>
    %3 = vector.shape_cast %2 : vector<1x16x16xf32> to vector<16x16xf32>
    %cst = arith.constant dense<0.000000e+00> : vector<130x16xf32>
    %4 = tpu.matmul %1, %3, %cst {dimension_numbers = #tpu.dot_dimension_numbers<[1], [0], [0], [1], [0, 0, 1, 1], [], []>} : vector<130x16xf32>, vector<16x16xf32>, vector<130x16xf32> -> vector<130x16xf32>
    %c1 = arith.constant 1 : index
    %c0_5 = arith.constant 0 : index
    %c0_6 = arith.constant 0 : index
    %5 = vector.load %arg2[%c1, %c0_5, %c0_6] : memref<2x16x16xf32, #tpu.memory_space<vmem>>, vector<1x16x16xf32>
    %6 = vector.shape_cast %5 : vector<1x16x16xf32> to vector<16x16xf32>
    %cst_7 = arith.constant dense<0.000000e+00> : vector<130x16xf32>
    %7 = tpu.matmul %1, %6, %cst_7 {dimension_numbers = #tpu.dot_dimension_numbers<[1], [0], [0], [1], [0, 0, 1, 1], [], []>} : vector<130x16xf32>, vector<16x16xf32>, vector<130x16xf32> -> vector<130x16xf32>
    %8 = tpu.concatenate %4, %7 in 1 : vector<130x16xf32>, vector<130x16xf32> -> vector<130x32xf32>
    %c0_8 = arith.constant 0 : index
    %c0_9 = arith.constant 0 : index
    %9 = vector.load %arg3[%c0_8, %c0_9] : memref<1x32xf32, #tpu.memory_space<vmem>>, vector<1x32xf32>
    %10 = vector.broadcast %9 : vector<1x32xf32> to vector<130x32xf32>
    %11 = arith.addf %8, %10 : vector<130x32xf32>
    %c0_10 = arith.constant 0 : index
    %c0_11 = arith.constant 0 : index
    %c0_12 = arith.constant 0 : index
    %12 = vector.load %arg4[%c0_10, %c0_11, %c0_12] : memref<1x130x32xf32, #tpu.memory_space<vmem>>, vector<1x130x32xf32>
    %13 = vector.shape_cast %12 : vector<1x130x32xf32> to vector<130x32xf32>
    %14 = vector.shape_cast %11 : vector<130x32xf32> to vector<1x130x32xf32>
    tpu.vector_store %arg4[%c0_10, %c0_11, %c0_12], %14 {strides = array<i32>} : memref<1x130x32xf32, #tpu.memory_space<vmem>>, vector<1x130x32xf32>,
    return
  }
  func.func @transform_0(%arg0: i32) -> (i32, i32, i32) {
    %c0_i32 = arith.constant 0 : i32
    %c0_i32_0 = arith.constant 0 : i32
    %c0_i32_1 = arith.constant 0 : i32
    return %arg0, %c0_i32, %c0_i32_0 : i32, i32, i32
  }
  func.func @transform_1(%arg0: i32) -> (i32, i32, i32) {
    %c0_i32 = arith.constant 0 : i32
    %c0_i32_0 = arith.constant 0 : i32
    %c0_i32_1 = arith.constant 0 : i32
    %c0_i32_2 = arith.constant 0 : i32
    return %c0_i32, %c0_i32_0, %c0_i32_1 : i32, i32, i32
  }
  func.func @transform_2(%arg0: i32) -> (i32, i32) {
    %c0_i32 = arith.constant 0 : i32
    %c0_i32_0 = arith.constant 0 : i32
    %c0_i32_1 = arith.constant 0 : i32
    return %c0_i32, %c0_i32_0 : i32, i32
  }
  func.func @transform_3(%arg0: i32) -> (i32, i32, i32) {
    %c0_i32 = arith.constant 0 : i32
    %c0_i32_0 = arith.constant 0 : i32
    %c0_i32_1 = arith.constant 0 : i32
    return %arg0, %c0_i32, %c0_i32_0 : i32, i32, i32
  }
}

module attributes {stable_mosaic.version = 11 : i64} {
  func.func @kernel(%arg0: i32, %arg1: memref<1x262x16xf32, #tpu.memory_space<vmem>>, %arg2: memref<7x16x8xf32, #tpu.memory_space<vmem>>, %arg3: memref<1x16xf32, #tpu.memory_space<vmem>>, %arg4: memref<1x64x16xf32, #tpu.memory_space<vmem>>) attributes {dimension_semantics = [#tpu.dimension_semantics<parallel>], iteration_bounds = array<i64: 2>, scalar_prefetch = 0 : i64, scratch_operands = 0 : i64, tpu.core_type = #tpu.core_type<tc>, window_params = [{transform_indices = @transform_0, window_bounds = array<i64: 1, 262, 16>}, {pipeline_mode = #tpu.pipeline_mode<synchronous>, transform_indices = @transform_1, window_bounds = array<i64: 7, 16, 8>}, {pipeline_mode = #tpu.pipeline_mode<synchronous>, transform_indices = @transform_2, window_bounds = array<i64: 1, 16>}, {transform_indices = @transform_3, window_bounds = array<i64: 1, 64, 16>}]} {
    %c0 = arith.constant 0 : index
    %c0_0 = arith.constant 0 : index
    %c0_1 = arith.constant 0 : index
    %0 = vector.load %arg1[%c0, %c0_0, %c0_1] : memref<1x262x16xf32, #tpu.memory_space<vmem>>, vector<1x262x16xf32>
    %1 = vector.shape_cast %0 : vector<1x262x16xf32> to vector<262x16xf32>
    %2 = vector.extract_strided_slice %1 {offsets = [3, 0], sizes = [64, 16], strides = [1, 1]} : vector<262x16xf32> to vector<64x16xf32>
    %c0_2 = arith.constant 0 : index
    %c0_3 = arith.constant 0 : index
    %c0_4 = arith.constant 0 : index
    %3 = vector.load %arg2[%c0_2, %c0_3, %c0_4] : memref<7x16x8xf32, #tpu.memory_space<vmem>>, vector<1x16x8xf32>
    %4 = vector.shape_cast %3 : vector<1x16x8xf32> to vector<16x8xf32>
    %cst = arith.constant dense<0.000000e+00> : vector<64x8xf32>
    %5 = tpu.matmul %2, %4, %cst {dimension_numbers = #tpu.dot_dimension_numbers<[1], [0], [0], [1], [0, 0, 1, 1], [], []>} : vector<64x16xf32>, vector<16x8xf32>, vector<64x8xf32> -> vector<64x8xf32>
    %6 = vector.extract_strided_slice %1 {offsets = [2, 0], sizes = [64, 16], strides = [1, 1]} : vector<262x16xf32> to vector<64x16xf32>
    %c2 = arith.constant 2 : index
    %c0_5 = arith.constant 0 : index
    %c0_6 = arith.constant 0 : index
    %7 = vector.load %arg2[%c2, %c0_5, %c0_6] : memref<7x16x8xf32, #tpu.memory_space<vmem>>, vector<1x16x8xf32>
    %8 = vector.shape_cast %7 : vector<1x16x8xf32> to vector<16x8xf32>
    %cst_7 = arith.constant dense<0.000000e+00> : vector<64x8xf32>
    %9 = tpu.matmul %6, %8, %cst_7 {dimension_numbers = #tpu.dot_dimension_numbers<[1], [0], [0], [1], [0, 0, 1, 1], [], []>} : vector<64x16xf32>, vector<16x8xf32>, vector<64x8xf32> -> vector<64x8xf32>
    %10 = arith.addf %5, %9 : vector<64x8xf32>
    %11 = vector.extract_strided_slice %1 {offsets = [1, 0], sizes = [64, 16], strides = [1, 1]} : vector<262x16xf32> to vector<64x16xf32>
    %c4 = arith.constant 4 : index
    %c0_8 = arith.constant 0 : index
    %c0_9 = arith.constant 0 : index
    %12 = vector.load %arg2[%c4, %c0_8, %c0_9] : memref<7x16x8xf32, #tpu.memory_space<vmem>>, vector<1x16x8xf32>
    %13 = vector.shape_cast %12 : vector<1x16x8xf32> to vector<16x8xf32>
    %cst_10 = arith.constant dense<0.000000e+00> : vector<64x8xf32>
    %14 = tpu.matmul %11, %13, %cst_10 {dimension_numbers = #tpu.dot_dimension_numbers<[1], [0], [0], [1], [0, 0, 1, 1], [], []>} : vector<64x16xf32>, vector<16x8xf32>, vector<64x8xf32> -> vector<64x8xf32>
    %15 = arith.addf %10, %14 : vector<64x8xf32>
    %16 = vector.extract_strided_slice %1 {offsets = [0, 0], sizes = [64, 16], strides = [1, 1]} : vector<262x16xf32> to vector<64x16xf32>
    %c6 = arith.constant 6 : index
    %c0_11 = arith.constant 0 : index
    %c0_12 = arith.constant 0 : index
    %17 = vector.load %arg2[%c6, %c0_11, %c0_12] : memref<7x16x8xf32, #tpu.memory_space<vmem>>, vector<1x16x8xf32>
    %18 = vector.shape_cast %17 : vector<1x16x8xf32> to vector<16x8xf32>
    %cst_13 = arith.constant dense<0.000000e+00> : vector<64x8xf32>
    %19 = tpu.matmul %16, %18, %cst_13 {dimension_numbers = #tpu.dot_dimension_numbers<[1], [0], [0], [1], [0, 0, 1, 1], [], []>} : vector<64x16xf32>, vector<16x8xf32>, vector<64x8xf32> -> vector<64x8xf32>
    %20 = arith.addf %15, %19 : vector<64x8xf32>
    %21 = vector.extract_strided_slice %1 {offsets = [3, 0], sizes = [64, 16], strides = [1, 1]} : vector<262x16xf32> to vector<64x16xf32>
    %c1 = arith.constant 1 : index
    %c0_14 = arith.constant 0 : index
    %c0_15 = arith.constant 0 : index
    %22 = vector.load %arg2[%c1, %c0_14, %c0_15] : memref<7x16x8xf32, #tpu.memory_space<vmem>>, vector<1x16x8xf32>
    %23 = vector.shape_cast %22 : vector<1x16x8xf32> to vector<16x8xf32>
    %cst_16 = arith.constant dense<0.000000e+00> : vector<64x8xf32>
    %24 = tpu.matmul %21, %23, %cst_16 {dimension_numbers = #tpu.dot_dimension_numbers<[1], [0], [0], [1], [0, 0, 1, 1], [], []>} : vector<64x16xf32>, vector<16x8xf32>, vector<64x8xf32> -> vector<64x8xf32>
    %25 = vector.extract_strided_slice %1 {offsets = [2, 0], sizes = [64, 16], strides = [1, 1]} : vector<262x16xf32> to vector<64x16xf32>
    %c3 = arith.constant 3 : index
    %c0_17 = arith.constant 0 : index
    %c0_18 = arith.constant 0 : index
    %26 = vector.load %arg2[%c3, %c0_17, %c0_18] : memref<7x16x8xf32, #tpu.memory_space<vmem>>, vector<1x16x8xf32>
    %27 = vector.shape_cast %26 : vector<1x16x8xf32> to vector<16x8xf32>
    %cst_19 = arith.constant dense<0.000000e+00> : vector<64x8xf32>
    %28 = tpu.matmul %25, %27, %cst_19 {dimension_numbers = #tpu.dot_dimension_numbers<[1], [0], [0], [1], [0, 0, 1, 1], [], []>} : vector<64x16xf32>, vector<16x8xf32>, vector<64x8xf32> -> vector<64x8xf32>
    %29 = arith.addf %24, %28 : vector<64x8xf32>
    %30 = vector.extract_strided_slice %1 {offsets = [1, 0], sizes = [64, 16], strides = [1, 1]} : vector<262x16xf32> to vector<64x16xf32>
    %c5 = arith.constant 5 : index
    %c0_20 = arith.constant 0 : index
    %c0_21 = arith.constant 0 : index
    %31 = vector.load %arg2[%c5, %c0_20, %c0_21] : memref<7x16x8xf32, #tpu.memory_space<vmem>>, vector<1x16x8xf32>
    %32 = vector.shape_cast %31 : vector<1x16x8xf32> to vector<16x8xf32>
    %cst_22 = arith.constant dense<0.000000e+00> : vector<64x8xf32>
    %33 = tpu.matmul %30, %32, %cst_22 {dimension_numbers = #tpu.dot_dimension_numbers<[1], [0], [0], [1], [0, 0, 1, 1], [], []>} : vector<64x16xf32>, vector<16x8xf32>, vector<64x8xf32> -> vector<64x8xf32>
    %34 = arith.addf %29, %33 : vector<64x8xf32>
    %35 = tpu.concatenate %20, %34 in 1 : vector<64x8xf32>, vector<64x8xf32> -> vector<64x16xf32>
    %c0_23 = arith.constant 0 : index
    %c0_24 = arith.constant 0 : index
    %36 = vector.load %arg3[%c0_23, %c0_24] : memref<1x16xf32, #tpu.memory_space<vmem>>, vector<1x16xf32>
    %37 = vector.broadcast %36 : vector<1x16xf32> to vector<64x16xf32>
    %38 = arith.addf %35, %37 : vector<64x16xf32>
    %cst_25 = arith.constant 0.000000e+00 : f32
    %39 = vector.broadcast %cst_25 : f32 to vector<64x16xf32>
    %40 = arith.maximumf %38, %39 : vector<64x16xf32>
    %c0_26 = arith.constant 0 : index
    %c0_27 = arith.constant 0 : index
    %c0_28 = arith.constant 0 : index
    %41 = vector.load %arg4[%c0_26, %c0_27, %c0_28] : memref<1x64x16xf32, #tpu.memory_space<vmem>>, vector<1x64x16xf32>
    %42 = vector.shape_cast %41 : vector<1x64x16xf32> to vector<64x16xf32>
    %43 = vector.shape_cast %40 : vector<64x16xf32> to vector<1x64x16xf32>
    tpu.vector_store %arg4[%c0_26, %c0_27, %c0_28], %43 {strides = array<i32>} : memref<1x64x16xf32, #tpu.memory_space<vmem>>, vector<1x64x16xf32>,
    return
  }
  func.func @transform_0(%arg0: i32) -> (i32, i32, i32) {
    %c0_i32 = arith.constant 0 : i32
    %c0_i32_0 = arith.constant 0 : i32
    %c0_i32_1 = arith.constant 0 : i32
    return %arg0, %c0_i32, %c0_i32_0 : i32, i32, i32
  }
  func.func @transform_1(%arg0: i32) -> (i32, i32, i32) {
    %c0_i32 = arith.constant 0 : i32
    %c0_i32_0 = arith.constant 0 : i32
    %c0_i32_1 = arith.constant 0 : i32
    %c0_i32_2 = arith.constant 0 : i32
    return %c0_i32, %c0_i32_0, %c0_i32_1 : i32, i32, i32
  }
  func.func @transform_2(%arg0: i32) -> (i32, i32) {
    %c0_i32 = arith.constant 0 : i32
    %c0_i32_0 = arith.constant 0 : i32
    %c0_i32_1 = arith.constant 0 : i32
    return %c0_i32, %c0_i32_0 : i32, i32
  }
  func.func @transform_3(%arg0: i32) -> (i32, i32, i32) {
    %c0_i32 = arith.constant 0 : i32
    %c0_i32_0 = arith.constant 0 : i32
    %c0_i32_1 = arith.constant 0 : i32
    return %arg0, %c0_i32, %c0_i32_0 : i32, i32, i32
  }
}

</mosaic_0001>

<bundles_post_ra>
// kernel: decoder_forward.6
= control target key start
LH: loop header
LB: loop body
LE: loop exit
PB: predicated region body
PF: predicated region fallthrough
CT: control target
= control target key end

     0   :  { %8 = vsyncpa [#allocation3], 0  ;;  %s132_s15 = smov [#allocation2]   ;;  %s133_s17 = smov 256   ;;  %s167_s0 = inlined_call_operand.vmem [shape: f32[2,32], index: 0, kind: input, shape index: {}]   ;;  %s168_s1 = inlined_call_operand.hbm [shape: f32[32,256], index: 1, kind: input, shape index: {}]   ;;  %s169_s2 = inlined_call_operand.vmem [shape: f32[1,256], index: 2, kind: input, shape index: {}]   ;;  %s170_s3 = inlined_call_operand.vmem [shape: f32[2,256], index: 3, kind: output, shape index: {}]  }
   0x1   :  { %s15_s14 = sshll.u32 %s168_s1, 4  ;;  %s17_s16 = sshll.u32 %s132_s15, 4  ;;  %s16_s14 = int_to_ptr.hbm [resolvable:$true] %s15_s14  ;;  %s18_s16 = int_to_ptr.vmem [resolvable:$true] %s17_s16 }
   0x2   :  { %s134_s18 = smov 16  }
   0x3   :  { %23 = dma.hbm_to_vmem [thread:$0]  %s16_s14, 1024, %s18_s16, [#allocation3], %s133_s17, %s133_s17, %s134_s18  }
   0x4   :  { %130 = dma.done.wait [#allocation3], 1024  }
   0x5   :  { %131 = vsyncadd [#allocation3], 4294966272  ;;  %v38_v0 = vld [vmem:[#allocation2 + $0x38] sm:$0xff]  ;;  %v37_v1 = vld [vmem:[#allocation2 + $0x30] sm:$0xff]  ;;  %vm45_vm0 = vcmask 261120   ;;  %vm92_vm1 = vcmask 1041408  }
   0x6   :  { %v36_v2 = vld [vmem:[#allocation2 + $0x28] sm:$0xff]  ;;  %81 = vmatpush.msra.mxu1 %v38_v0  ;;  %61 = vmatpush.msra.mxu0 %v37_v1  ;;  %v35_v3 = vld [vmem:[#allocation2 + $0x20] sm:$0xff]  ;;  %v34_v4 = vld [vmem:[#allocation2 + $0x18] sm:$0xff] }
   0x7   :  { %v33_v5 = vld [vmem:[#allocation2 + $0x10] sm:$0xff]  ;;  %v32_v6 = vld [vmem:[#allocation2 + $0x8] sm:$0xff]  ;;  %v31_v7 = vld [vmem:[#allocation2] sm:$0xff] }
   0x8   :  { %82 = vmatpush.msra.mxu1 %v36_v2  ;;  %62 = vmatpush.msra.mxu0 %v35_v3  ;;  %v30_v8 = vld [vmem:[%s167_s0] sm:$0x3] }
   0x9   :  { %v39_v9 = vld [vmem:[%s169_s2] sm:$0x3] }
   0xa   :  { %83 = vmatpush.msra.mxu1 %v34_v4  ;;  %63 = vmatpush.msra.mxu0 %v33_v5  ;;  %v42_v10 = vperm.slane %v39_v9, 1  ;;  %v41_v11 = vperm.slane %v39_v9, 0 }
   0xc   :  { %84 = vmatpush.msra.mxu1 %v32_v6  ;;  %64 = vmatpush.msra.mxu0 %v31_v7 }
   0xd   :  { %102 = vmatmul.msk.f32.vlgmr.msra.gmra.mxu1 %vm45_vm0, %v30_v8  ;;  %101 = vmatmul.msk.f32.vlgmr.msra.gmra.mxu0 %vm45_vm0, %v30_v8 }
  0x8a   :  { %v86_v12 = vpop.f32.mrf.mxu1  ;;  %v66_v13 = vpop.f32.mrf.mxu0 }
  0x8b   :  { %v87_v14 = vadd.f32 %v86_v12, %v42_v10  ;;  %v67_v15 = vadd.f32 %v66_v13, %v41_v11 }
  0x8d   :  { %v91_v16 = vrot.slane %v87_v14, 6 }
  0x8f   :  { %v93_v17 = vsel %vm92_vm1, %v67_v15, %v91_v16 }
  0x90   :  { %95 = vst [vmem:[%s170_s3] sm:$0xf] %v93_v17 }
  0x91   :  { %100 = vsyncpa [#allocation3], 1 }

// kernel: decoder_forward.8
= control target key start
LH: loop header
LB: loop body
LE: loop exit
PB: predicated region body
PF: predicated region fallthrough
CT: control target
= control target key end

     0   :  { %s405_s12 = smov 0   ;;  %s460_s0 = inlined_call_operand.vmem [shape: f32[2,32,16], index: 0, kind: input, shape index: {}]   ;;  %s461_s1 = inlined_call_operand.vmem [shape: f32[2,16,16], index: 1, kind: input, shape index: {}]   ;;  %s462_s2 = inlined_call_operand.vmem [shape: f32[1,32], index: 2, kind: input, shape index: {}]   ;;  %s463_s3 = inlined_call_operand.vmem [shape: f32[2,32,32], index: 3, kind: output, shape index: {}]  }
   0x1 LB: > { %s339_s13 = sadd.s32 4294967295, %s382_s12   ;;  %p343_p0 = scmp.ge.s32.totalorder %s382_s12, 1  ;;  %s382_s12 = sphi %s405_s12, %s13_s12  }
   0x2   : > { %p137_p1 = scmp.lt.s32.totalorder %s382_s12, 3 }
   0x4   : > { %p138_p2 = pnand %p343_p0, %p137_p1 }
   0x5   : > { %p161_p3 = scmp.lt.s32.totalorder (!%p138_p2), %s339_s13, 1  ;;  %s384_s26 = smov (!%p138_p2), 16  }
   0x6   : > { %141 = sbr.rel (%p138_p2) target bundleno = 275 (0x113), region = 32 }
   0xb   : > { %v353_v0 = vld [vmem:[%s461_s1 + $0x18] sm:$0xff]  ;;  %v352_v1 = vld [vmem:[%s461_s1 + $0x10] sm:$0xff]  ;;  %v176_v2 = vld [vmem:[%s461_s1 + $0x8] sm:$0xff]  ;;  %s465_s13 = smov (!%p161_p3, %s339_s13), 1  ;;  %vm177_vm0 = vcmask 130048   ;;  %vm279_vm1 = vcmask 261120  }
   0xc   : > { %364 = vmatpush.msra.mxu3 %v353_v0  ;;  %236 = vmatpush.msra.mxu1 %v353_v0  ;;  %v175_v3 = vld [vmem:[%s461_s1] sm:$0xff]  ;;  %s360_s22 = sshll.u32 %s465_s13, 5 }
   0xd   : > { %362 = vmatpush.msra.mxu2 %v176_v2  ;;  %204 = vmatpush.msra.mxu0 %v176_v2  ;;  %s165_s25 = scalar_lea.vmem %s460_s0, %s360_s22  ;;  %v375_v13 = vld [vmem:[%s462_s2] ss:$0 sm:$0xff]  ;;  %s170_s4 = scalar_lea.vmem %s463_s3, %s360_s22 }
   0xe   : > { %365 = vmatpush.msra.mxu3 %v352_v1  ;;  %237 = vmatpush.msra.mxu1 %v352_v1  ;;  %v173_v4 = vld [vmem:[%s165_s25 + $0x10] sm:$0xff]  ;;  %v171_v5 = vld [vmem:[%s165_s25] sm:$0xff]  ;;  %v174_v6 = vld [vmem:[%s165_s25 + $0x18] sm:$0xff] }
   0xf   : > { %363 = vmatpush.msra.mxu2 %v175_v3  ;;  %205 = vmatpush.msra.mxu0 %v175_v3  ;;  %v172_v7 = vld [vmem:[%s165_s25 + $0x8] sm:$0xff] }
  0x10   : > { %356 = vmatmul.msk.f32.vlgmr.msra.gmra.mxu3 %vm177_vm0, %v173_v4  ;;  %354 = vmatmul.msk.f32.vlgmr.msra.gmra.mxu1 %vm177_vm0, %v171_v5 }
  0x11   : > { %350 = vmatmul.msk.f32.vlgmr.msra.gmra.mxu2 %vm177_vm0, %v173_v4  ;;  %348 = vmatmul.msk.f32.vlgmr.msra.gmra.mxu0 %vm177_vm0, %v171_v5 }
  0x18   : > { %357 = vmatmul.msk.f32.gmra.mxu3 %vm177_vm0, %v174_v6  ;;  %355 = vmatmul.msk.f32.gmra.mxu1 %vm177_vm0, %v172_v7 }
  0x19   : > { %351 = vmatmul.msk.f32.gmra.mxu2 %vm177_vm0, %v174_v6  ;;  %349 = vmatmul.msk.f32.gmra.mxu0 %vm177_vm0, %v172_v7 }
  0x8d   : > { %v239_v8 = vpop.f32.mrf.mxu1 }
  0x8e   : > { %255 = vrot.lane.b32.xlu0 %v239_v8, %s384_s26  ;;  %v207_v12 = vpop.f32.mrf.mxu0 }
  0x93   : > { %v245_v9 = vpop.f32.mrf.mxu3 }
  0x94   : > { %259 = vrot.lane.b32.xlu1 %v245_v9, %s384_s26  ;;  %v213_v16 = vpop.f32.mrf.mxu2 }
  0x95   : > { %v242_v10 = vpop.f32.mrf.mxu1 }
  0x96   : > { %257 = vrot.lane.b32.xlu0 %v242_v10, %s384_s26  ;;  %v210_v19 = vpop.f32.mrf.mxu0 }
  0x9b   : > { %v248_v11 = vpop.f32.mrf.mxu3 }
  0x9c   : > { %261 = vrot.lane.b32.xlu1 %v248_v11, %s384_s26  ;;  %v216_v25 = vpop.f32.mrf.mxu2 }
 0x100   : > { %v256_v14 = vpop.permute.xlu0 %255 }
 0x101   : > { %v267_v15 = vsel %vm177_vm0, %v207_v12, %v256_v14 }
 0x102   : > { %v275_v17 = vadd.f32 %v375_v13, %v267_v15 }
 0x104   : > { %280 = vst.msk [vmem:[%s170_s4] sm:$0xff] %vm279_vm1, %v275_v17 }
 0x106   : > { %v260_v18 = vpop.permute.xlu1 %259 }
 0x107   : > { %v269_v20 = vsel %vm177_vm0, %v213_v16, %v260_v18 }
 0x108   : > { %v277_v21 = vadd.f32 %v375_v13, %v269_v20  ;;  %v258_v22 = vpop.permute.xlu0 %257 }
 0x109   : > { %v268_v23 = vsel %vm177_vm0, %v210_v19, %v258_v22 }
 0x10a   : > { %282 = vst.msk [vmem:[%s170_s4 + $0x10] sm:$0xff] %vm279_vm1, %v277_v21  ;;  %v276_v24 = vadd.f32 %v375_v13, %v268_v23 }
 0x10c   : > { %281 = vst.msk [vmem:[%s170_s4 + $0x8] sm:$0xff] %vm279_vm1, %v276_v24 }
 0x10e   : > { %v262_v26 = vpop.permute.xlu1 %261 }
 0x10f   : > { %v270_v27 = vsel %vm177_vm0, %v216_v25, %v262_v26 }
 0x110   : > { %v278_v28 = vadd.f32 %v375_v13, %v270_v27 }
 0x112   : > { %283 = vst.msk [vmem:[%s170_s4 + $0x18] sm:$0xff] %vm279_vm1, %v278_v28 }
 0x113 PF: > { %s13_s12 = sadd.s32 1, %s382_s12  }
 0x114   : > { %p10_p4 = scmp.ge.s32.totalorder %s13_s12, 4  }
 0x116   :  { %12 = sbr.rel (!%p10_p4) target bundleno = 1 (0x1), region = 63 }

// kernel: decoder_forward.7
= control target key start
LH: loop header
LB: loop body
LE: loop exit
PB: predicated region body
PF: predicated region fallthrough
CT: control target
= control target key end

     0   :  { %s554_s12 = smov 0   ;;  %s640_s0 = inlined_call_operand.vmem [shape: f32[2,19,16], index: 0, kind: input, shape index: {}]   ;;  %s641_s1 = inlined_call_operand.vmem [shape: f32[7,16,16], index: 1, kind: input, shape index: {}]   ;;  %s642_s2 = inlined_call_operand.vmem [shape: f32[1,32], index: 2, kind: input, shape index: {}]   ;;  %s643_s3 = inlined_call_operand.vmem [shape: f32[2,16,32], index: 3, kind: output, shape index: {}]  }
   0x1 LB: > { %s475_s13 = sadd.s32 4294967295, %s531_s12   ;;  %p479_p0 = scmp.ge.s32.totalorder %s531_s12, 1  ;;  %s531_s12 = sphi %s554_s12, %s13_s12  }
   0x2   : > { %p137_p1 = scmp.lt.s32.totalorder %s531_s12, 3 }
   0x4   : > { %p138_p2 = pnand %p479_p0, %p137_p1 }
   0x5   : > { %p161_p3 = scmp.lt.s32.totalorder (!%p138_p2), %s475_s13, 1  ;;  %s533_s21 = smov (!%p138_p2), 16  }
   0x6   : > { %141 = sbr.rel (%p138_p2) target bundleno = 299 (0x12b), region = 32 }
   0xb   : > { %v492_v0 = vld [vmem:[%s641_s1 + $0x58] sm:$0xff]  ;;  %v491_v1 = vld [vmem:[%s641_s1 + $0x50] sm:$0xff]  ;;  %v506_v3 = vld [vmem:[%s641_s1 + $0x68] sm:$0xff]  ;;  %s645_s13 = smov (!%p161_p3, %s475_s13), 1  ;;  %vm189_vm0 = vcmask 130048   ;;  %vm217_vm1 = vcmask 1045504  }
   0xc   : > { %v484_v2 = vld [vmem:[%s641_s1 + $0x18] sm:$0xff]  ;;  %271 = vmatpush.msra.mxu2 %v492_v0  ;;  %v483_v5 = vld [vmem:[%s641_s1 + $0x10] sm:$0xff]  ;;  %v502_v7 = vld [vmem:[%s641_s1 + $0x48] sm:$0xff]  ;;  %s514_s7 = smul.u32 24, %s645_s13  ;;  %vm183_vm2 = vcmask 1046528   ;;  %vm310_vm3 = vcmask 1044480  }
   0xd   : > { %241 = vmatpush.msra.mxu1 %v484_v2  ;;  %v486_v4 = vld [vmem:[%s641_s1 + $0x38] sm:$0xff]  ;;  %v485_v6 = vld [vmem:[%s641_s1 + $0x30] sm:$0xff]  ;;  %v496_v8 = vld [vmem:[%s641_s1 + $0x28] sm:$0xff]  ;;  %s511_s24 = sshll.u32 %s645_s13, 4  ;;  %vm417_vm4 = vcmask 261120  }
   0xe   : > { %208 = vmatpush.msra.mxu0 %v486_v4  ;;  %512 = vmatpush.msra.mxu3 %v486_v4  ;;  %v505_v9 = vld [vmem:[%s641_s1 + $0x60] sm:$0xff]  ;;  %v283_v10 = vld [vmem:[%s641_s1 + $0x8] sm:$0xff]  ;;  %s165_s18 = scalar_lea.vmem %s640_s0, %s514_s7  ;;  %s170_s27 = scalar_lea.vmem %s643_s3, %s511_s24 }
   0xf   : > { %272 = vmatpush.msra.mxu2 %v491_v1  ;;  %242 = vmatpush.msra.mxu1 %v483_v5  ;;  %v501_v11 = vld [vmem:[%s641_s1 + $0x40] sm:$0xff]  ;;  %v172_v15 = vld [vmem:[%s165_s18 + $0x8] sm:$0xff]  ;;  %v173_v16 = vld [vmem:[%s165_s18 + $0x10] sm:$0x7] }
  0x10   : > { %209 = vmatpush.msra.mxu0 %v485_v6  ;;  %513 = vmatpush.msra.mxu3 %v485_v6  ;;  %v495_v12 = vld [vmem:[%s641_s1 + $0x20] sm:$0xff]  ;;  %v219_v18 = vrot.slane %v172_v15, 2  ;;  %v185_v20 = vrot.slane %v172_v15, 1  ;;  %v187_v21 = vrot.slane %v173_v16, 1  ;;  %v221_v25 = vrot.slane %v173_v16, 2 }
  0x11   : > { %388 = vmatpush.msrb.mxu2 %v506_v3  ;;  %360 = vmatpush.msrb.mxu1 %v502_v7  ;;  %v282_v13 = vld [vmem:[%s641_s1] sm:$0xff]  ;;  %v312_v27 = vrot.slane %v172_v15, 3  ;;  %v314_v30 = vrot.slane %v173_v16, 3 }
  0x12   : > { %301 = vmatpush.msrb.mxu3 %v496_v8  ;;  %v171_v14 = vld [vmem:[%s165_s18] sm:$0xff]  ;;  %334 = vmatpush.msrb.mxu0 %v283_v10  ;;  %v188_v24 = vsel %vm183_vm2, %v185_v20, %v187_v21  ;;  %v222_v28 = vsel %vm217_vm1, %v219_v18, %v221_v25 }
  0x13   : > { %389 = vmatpush.msrb.mxu2 %v505_v9  ;;  %361 = vmatpush.msrb.mxu1 %v501_v11  ;;  %v218_v17 = vrot.slane %v171_v14, 2  ;;  %v184_v19 = vrot.slane %v171_v14, 1  ;;  %v311_v26 = vrot.slane %v171_v14, 3  ;;  %v315_v31 = vsel %vm310_vm3, %v312_v27, %v314_v30  ;;  %v524_v56 = vld [vmem:[%s642_s2] ss:$0 sm:$0xff] }
  0x14   : > { %493 = vmatmul.msk.f32.vlgmr.msra.gmra.mxu2 %vm189_vm0, %v171_v14  ;;  %302 = vmatpush.msrb.mxu3 %v495_v12 }
  0x15   : > { %335 = vmatpush.msrb.mxu0 %v282_v13  ;;  %v220_v22 = vsel %vm217_vm1, %v218_v17, %v219_v18  ;;  %v186_v23 = vsel %vm183_vm2, %v184_v19, %v185_v20  ;;  %488 = vmatmul.msk.f32.vlgmr.msra.gmra.mxu3 %vm189_vm0, %v188_v24  ;;  %v313_v29 = vsel %vm310_vm3, %v311_v26, %v312_v27 }
  0x16   : > { %489 = vmatmul.msk.f32.vlgmr.msra.gmra.mxu1 %vm189_vm0, %v220_v22  ;;  %487 = vmatmul.msk.f32.vlgmr.msra.gmra.mxu0 %vm189_vm0, %v186_v23 }
  0x1c   : > { %494 = vmatmul.msk.f32.gmra.mxu2 %vm189_vm0, %v172_v15 }
  0x1d   : > { %497 = vmatmul.msk.f32.vlgmr.msrb.gmra.mxu3 %vm189_vm0, %v220_v22 }
  0x1e   : > { %490 = vmatmul.msk.f32.gmra.mxu1 %vm189_vm0, %v222_v28  ;;  %499 = vmatmul.msk.f32.vlgmr.msrb.gmra.mxu0 %vm189_vm0, %v313_v29 }
  0x24   : > { %507 = vmatmul.msk.f32.vlgmr.msrb.gmra.mxu2 %vm189_vm0, %v171_v14 }
  0x25   : > { %498 = vmatmul.msk.f32.gmra.mxu3 %vm189_vm0, %v222_v28 }
  0x26   : > { %503 = vmatmul.msk.f32.vlgmr.msrb.gmra.mxu1 %vm189_vm0, %v186_v23  ;;  %500 = vmatmul.msk.f32.gmra.mxu0 %vm189_vm0, %v315_v31 }
  0x2c   : > { %508 = vmatmul.msk.f32.gmra.mxu2 %vm189_vm0, %v172_v15 }
  0x2e   : > { %504 = vmatmul.msk.f32.gmra.mxu1 %vm189_vm0, %v188_v24 }
  0x93   : > { %v244_v32 = vpop.f32.mrf.mxu1  ;;  %v211_v33 = vpop.f32.mrf.mxu0 }
  0x94   : > { %v245_v34 = vadd.f32 %v244_v32, %v211_v33 }
  0x97   : > { %v274_v35 = vpop.f32.mrf.mxu2 }
  0x98   : > { %v280_v36 = vadd.f32 %v274_v35, %v245_v34  ;;  %v214_v37 = vpop.f32.mrf.mxu3 }
  0x9b   : > { %v247_v38 = vpop.f32.mrf.mxu1  ;;  %v337_v41 = vpop.f32.mrf.mxu0 }
  0x9c   : > { %v248_v39 = vadd.f32 %v247_v38, %v214_v37 }
  0x9f   : > { %v277_v40 = vpop.f32.mrf.mxu2 }
  0xa0   : > { %v281_v42 = vadd.f32 %v277_v40, %v248_v39  ;;  %v304_v43 = vpop.f32.mrf.mxu3 }
  0xa1   : > { %v338_v44 = vadd.f32 %v337_v41, %v304_v43 }
  0xa3   : > { %v363_v45 = vpop.f32.mrf.mxu1  ;;  %v340_v49 = vpop.f32.mrf.mxu0 }
  0xa4   : > { %v369_v46 = vadd.f32 %v363_v45, %v338_v44 }
  0xa7   : > { %v391_v47 = vpop.f32.mrf.mxu2 }
  0xa8   : > { %v397_v48 = vadd.f32 %v391_v47, %v369_v46  ;;  %v307_v50 = vpop.f32.mrf.mxu3 }
  0xa9   : > { %v341_v51 = vadd.f32 %v340_v49, %v307_v50 }
  0xaa   : > { %401 = vrot.lane.b32.xlu0 %v397_v48, %s533_s21 }
  0xab   : > { %v366_v52 = vpop.f32.mrf.mxu1 }
  0xac   : > { %v370_v53 = vadd.f32 %v366_v52, %v341_v51 }
  0xaf   : > { %v394_v54 = vpop.f32.mrf.mxu2 }
  0xb0   : > { %v398_v55 = vadd.f32 %v394_v54, %v370_v53 }
  0xb2   : > { %403 = vrot.lane.b32.xlu0 %v398_v55, %s533_s21 }
 0x11c   : > { %v402_v57 = vpop.permute.xlu0 %401 }
 0x11d   : > { %v407_v58 = vsel %vm189_vm0, %v280_v36, %v402_v57 }
 0x11e   : > { %v413_v59 = vadd.f32 %v524_v56, %v407_v58 }
 0x120   : > { %v415_v60 = vmax.f32 %v413_v59, 0.0 }
 0x122   : > { %418 = vst.msk [vmem:[%s170_s27] sm:$0xff] %vm417_vm4, %v415_v60 }
 0x124   : > { %v404_v61 = vpop.permute.xlu0 %403 }
 0x125   : > { %v408_v62 = vsel %vm189_vm0, %v281_v42, %v404_v61 }
 0x126   : > { %v414_v63 = vadd.f32 %v524_v56, %v408_v62 }
 0x128   : > { %v416_v0 = vmax.f32 %v414_v63, 0.0 }
 0x12a   : > { %419 = vst.msk [vmem:[%s170_s27 + $0x8] sm:$0xff] %vm417_vm4, %v416_v0 }
 0x12b PF: > { %s13_s12 = sadd.s32 1, %s531_s12  }
 0x12c   : > { %p10_p4 = scmp.ge.s32.totalorder %s13_s12, 4  }
 0x12e   :  { %12 = sbr.rel (!%p10_p4) target bundleno = 1 (0x1), region = 68 }

// kernel: decoder_forward.9
= control target key start
LH: loop header
LB: loop body
LE: loop exit
PB: predicated region body
PF: predicated region fallthrough
CT: control target
= control target key end

     0   :  { %s934_s12 = smov 0   ;;  %s1270_s0 = inlined_call_operand.vmem [shape: f32[2,68,16], index: 0, kind: input, shape index: {}]   ;;  %s1271_s1 = inlined_call_operand.vmem [shape: f32[7,16,16], index: 1, kind: input, shape index: {}]   ;;  %s1272_s2 = inlined_call_operand.vmem [shape: f32[1,32], index: 2, kind: input, shape index: {}]   ;;  %s1273_s3 = inlined_call_operand.vmem [shape: f32[2,65,32], index: 3, kind: output, shape index: {}]  }
   0x1 LB: > { %s804_s13 = sadd.s32 4294967295, %s911_s12   ;;  %p808_p0 = scmp.ge.s32.totalorder %s911_s12, 1  ;;  %s911_s12 = sphi %s934_s12, %s13_s12  }
   0x2   : > { %p137_p1 = scmp.lt.s32.totalorder %s911_s12, 3 }
   0x4   : > { %p138_p2 = pnand %p808_p0, %p137_p1 }
   0x5   : > { %p161_p3 = scmp.lt.s32.totalorder (!%p138_p2), %s804_s13, 1  ;;  %s913_s21 = smov (!%p138_p2), 16  }
   0x6   : > { %141 = sbr.rel (%p138_p2) target bundleno = 387 (0x183), region = 32 }
   0xb   : > { %v812_v0 = vld [vmem:[%s1271_s1 + $0x28] sm:$0xff]  ;;  %v811_v2 = vld [vmem:[%s1271_s1 + $0x20] sm:$0xff]  ;;  %v876_v4 = vld [vmem:[%s1271_s1 + $0x58] sm:$0xff]  ;;  %s1275_s13 = smov (!%p161_p3, %s804_s13), 1  ;;  %vm194_vm0 = vcmask 1045504   ;;  %vm212_vm1 = vcmask 130048  }
   0xc   : > { %v832_v1 = vld [vmem:[%s1271_s1 + $0x48] sm:$0xff]  ;;  %888 = vmatpush.msra.mxu3 %v812_v0  ;;  %v831_v3 = vld [vmem:[%s1271_s1 + $0x40] sm:$0xff]  ;;  %245 = vmatpush.msra.mxu0 %v812_v0  ;;  %v856_v7 = vld [vmem:[%s1271_s1 + $0x38] sm:$0xff]  ;;  %s894_s5 = smul.u32 72, %s1275_s13  ;;  %vm358_vm2 = vcmask 1046528   ;;  %vm275_vm3 = vcmask 1044480  }
   0xd   : > { %408 = vmatpush.msra.mxu2 %v832_v1  ;;  %v181_v5 = vld [vmem:[%s1271_s1 + $0x8] sm:$0xff]  ;;  %v180_v6 = vld [vmem:[%s1271_s1] sm:$0xff]  ;;  %v854_v8 = vld [vmem:[%s1271_s1 + $0x18] sm:$0xff]  ;;  %vm738_vm4 = vcmask 261120   ;;  %vm747_vm5 = vcmask 253952  }
   0xe   : > { %325 = vmatpush.msra.mxu1 %v181_v5  ;;  %889 = vmatpush.msra.mxu3 %v811_v2  ;;  %v875_v9 = vld [vmem:[%s1271_s1 + $0x50] sm:$0xff]  ;;  %s980_s10 = scalar_lea.vmem %s1270_s0, %s894_s5  ;;  %v843_v46 = vld [vmem:[%s1271_s1 + $0x68] sm:$0xff]  ;;  %v842_v47 = vld [vmem:[%s1271_s1 + $0x60] sm:$0xff]  ;;  %s1232_s26 = scalar_lea.vmem %s1273_s3, %s894_s5 }
   0xf   : > { %409 = vmatpush.msra.mxu2 %v831_v3  ;;  %246 = vmatpush.msra.mxu0 %v811_v2  ;;  %v983_v10 = vld [vmem:[%s980_s10 + $0x38] sm:$0xff]  ;;  %v986_v11 = vld [vmem:[%s980_s10 + $0x40] sm:$0xf]  ;;  %v996_v15 = vld [vmem:[%s980_s10 + $0x8] sm:$0xff] }
  0x10   : > { %326 = vmatpush.msra.mxu1 %v180_v6  ;;  %890 = vmatpush.msrb.mxu3 %v181_v5  ;;  %v989_v12 = vld [vmem:[%s980_s10] sm:$0xff]  ;;  %v208_v13 = vrot.slane %v983_v10, 2  ;;  %v993_v14 = vrot.slane %v986_v11, 2  ;;  %v360_v18 = vrot.slane %v996_v15, 1  ;;  %v196_v19 = vrot.slane %v996_v15, 2  ;;  %v1011_v23 = vld [vmem:[%s980_s10 + $0x10] sm:$0xff] }
  0x11   : > { %632 = vmatpush.msrb.mxu2 %v876_v4  ;;  %541 = vmatpush.msrb.mxu0 %v856_v7  ;;  %v359_v16 = vrot.slane %v989_v12, 1  ;;  %v195_v17 = vrot.slane %v989_v12, 2  ;;  %v276_v20 = vrot.slane %v989_v12, 3  ;;  %v277_v21 = vrot.slane %v996_v15, 3  ;;  %v855_v27 = vld [vmem:[%s1271_s1 + $0x30] sm:$0xff]  ;;  %v1049_v35 = vld [vmem:[%s980_s10 + $0x18] sm:$0xff] }
  0x12   : > { %585 = vmatpush.msrb.mxu1 %v854_v8  ;;  %891 = vmatpush.msrb.mxu3 %v180_v6  ;;  %v1008_v22 = vsel %vm194_vm0, %v208_v13, %v993_v14  ;;  %v853_v28 = vld [vmem:[%s1271_s1 + $0x10] sm:$0xff]  ;;  %v362_v29 = vrot.slane %v1011_v23, 1  ;;  %v198_v30 = vrot.slane %v1011_v23, 2  ;;  %v279_v31 = vrot.slane %v1011_v23, 3  ;;  %v1080_v45 = vld [vmem:[%s980_s10 + $0x20] sm:$0xff]  ;;  %v176_v54 = vld [vmem:[%s980_s10 + $0x28] sm:$0xff] }
  0x13   : > { %633 = vmatpush.msrb.mxu2 %v875_v9  ;;  %820 = vmatmul.msk.f32.vlgmr.msra.gmra.mxu3 %vm212_vm1, %v1008_v22  ;;  %v1016_v24 = vsel %vm358_vm2, %v359_v16, %v360_v18  ;;  %v1019_v25 = vsel %vm194_vm0, %v195_v17, %v196_v19  ;;  %v1022_v26 = vsel %vm275_vm3, %v276_v20, %v277_v21  ;;  %v289_v36 = vrot.slane %v983_v10, 3  ;;  %v177_v0 = vld [vmem:[%s980_s10 + $0x30] sm:$0xff] }
  0x14   : > { %833 = vmatmul.msk.f32.vlgmr.msra.gmra.mxu2 %vm212_vm1, %v1016_v24  ;;  %813 = vmatmul.msk.f32.vlgmr.msra.gmra.mxu0 %vm212_vm1, %v1019_v25  ;;  %v1040_v32 = vsel %vm358_vm2, %v360_v18, %v362_v29  ;;  %v1043_v33 = vsel %vm194_vm0, %v196_v19, %v198_v30  ;;  %v1046_v34 = vsel %vm275_vm3, %v277_v21, %v279_v31  ;;  %v1059_v37 = vrot.slane %v986_v11, 3 }
  0x15   : > { %822 = vmatmul.msk.f32.vlgmr.msra.gmra.mxu1 %vm212_vm1, %v1022_v26  ;;  %892 = vmatpush.msra.mxu3 %v832_v1  ;;  %v364_v38 = vrot.slane %v1049_v35, 1  ;;  %v200_v39 = vrot.slane %v1049_v35, 2  ;;  %v281_v40 = vrot.slane %v1049_v35, 3  ;;  %v366_v48 = vrot.slane %v1080_v45, 1 }
  0x16   : > { %542 = vmatpush.msrb.mxu0 %v855_v27  ;;  %586 = vmatpush.msrb.mxu1 %v853_v28  ;;  %v1068_v41 = vsel %vm275_vm3, %v289_v36, %v1059_v37  ;;  %v202_v49 = vrot.slane %v1080_v45, 2  ;;  %v283_v50 = vrot.slane %v1080_v45, 3  ;;  %v372_v55 = vrot.slane %v983_v10, 1 }
  0x17   : > { %893 = vmatpush.msra.mxu3 %v831_v3  ;;  %v1071_v42 = vsel %vm358_vm2, %v362_v29, %v364_v38  ;;  %v1074_v43 = vsel %vm194_vm0, %v198_v30, %v200_v39  ;;  %v1077_v44 = vsel %vm275_vm3, %v279_v31, %v281_v40  ;;  %v367_v51 = vsel %vm358_vm2, %v364_v38, %v366_v48 }
  0x18   : > { %v203_v52 = vsel %vm194_vm0, %v200_v39, %v202_v49  ;;  %v284_v53 = vsel %vm275_vm3, %v281_v40, %v283_v50  ;;  %v1109_v56 = vrot.slane %v986_v11, 1  ;;  %v368_v57 = vrot.slane %v176_v54, 1 }
  0x19   : > { %v204_v58 = vrot.slane %v176_v54, 2  ;;  %v285_v59 = vrot.slane %v176_v54, 3  ;;  %v370_v1 = vrot.slane %v177_v0, 1  ;;  %v206_v2 = vrot.slane %v177_v0, 2 }
  0x1a   : > { %v375_v60 = vsel %vm358_vm2, %v372_v55, %v1109_v56  ;;  %v369_v61 = vsel %vm358_vm2, %v366_v48, %v368_v57  ;;  %v287_v3 = vrot.slane %v177_v0, 3 }
  0x1b   : > { %821 = vmatmul.msk.f32.gmra.mxu3 %vm212_vm1, %v993_v14  ;;  %v205_v62 = vsel %vm194_vm0, %v202_v49, %v204_v58  ;;  %v286_v63 = vsel %vm275_vm3, %v283_v50, %v285_v59  ;;  %v371_v4 = vsel %vm358_vm2, %v368_v57, %v370_v1  ;;  %v207_v5 = vsel %vm194_vm0, %v204_v58, %v206_v2 }
  0x1c   : > { %834 = vmatmul.msk.f32.gmra.mxu2 %vm212_vm1, %v1040_v32  ;;  %814 = vmatmul.msk.f32.gmra.mxu0 %vm212_vm1, %v1043_v33  ;;  %v288_v6 = vsel %vm275_vm3, %v285_v59, %v287_v3  ;;  %v373_v7 = vsel %vm358_vm2, %v370_v1, %v372_v55  ;;  %v209_v8 = vsel %vm194_vm0, %v206_v2, %v208_v13 }
  0x1d   : > { %823 = vmatmul.msk.f32.gmra.mxu1 %vm212_vm1, %v1046_v34  ;;  %v290_v9 = vsel %vm275_vm3, %v287_v3, %v289_v36 }
  0x23   : > { %829 = vmatmul.msk.f32.vlgmr.msrb.gmra.mxu3 %vm212_vm1, %v1068_v41 }
  0x24   : > { %835 = vmatmul.msk.f32.gmra.mxu2 %vm212_vm1, %v1071_v42  ;;  %815 = vmatmul.msk.f32.gmra.mxu0 %vm212_vm1, %v1074_v43 }
  0x25   : > { %824 = vmatmul.msk.f32.gmra.mxu1 %vm212_vm1, %v1077_v44  ;;  %482 = vmatpush.msrb.mxu3 %v843_v46 }
  0x27   : > { %483 = vmatpush.msrb.mxu3 %v842_v47 }
  0x2b   : > { %830 = vmatmul.msk.f32.gmra.mxu3 %vm212_vm1, %v1059_v37 }
  0x2c   : > { %836 = vmatmul.msk.f32.gmra.mxu2 %vm212_vm1, %v367_v51  ;;  %816 = vmatmul.msk.f32.gmra.mxu0 %vm212_vm1, %v203_v52 }
  0x2d   : > { %825 = vmatmul.msk.f32.gmra.mxu1 %vm212_vm1, %v284_v53 }
  0x33   : > { %840 = vmatmul.msk.f32.vlgmr.msra.gmra.mxu3 %vm212_vm1, %v375_v60 }
  0x34   : > { %837 = vmatmul.msk.f32.gmra.mxu2 %vm212_vm1, %v369_v61  ;;  %817 = vmatmul.msk.f32.gmra.mxu0 %vm212_vm1, %v205_v62 }
  0x35   : > { %826 = vmatmul.msk.f32.gmra.mxu1 %vm212_vm1, %v286_v63 }
  0x3b   : > { %841 = vmatmul.msk.f32.gmra.mxu3 %vm212_vm1, %v1109_v56 }
  0x3c   : > { %838 = vmatmul.msk.f32.gmra.mxu2 %vm212_vm1, %v371_v4  ;;  %818 = vmatmul.msk.f32.gmra.mxu0 %vm212_vm1, %v207_v5 }
  0x3d   : > { %827 = vmatmul.msk.f32.gmra.mxu1 %vm212_vm1, %v288_v6 }
  0x43   : > { %844 = vmatmul.msk.f32.vlgmr.msrb.gmra.mxu3 %vm212_vm1, %v989_v12 }
  0x44   : > { %839 = vmatmul.msk.f32.gmra.mxu2 %vm212_vm1, %v373_v7  ;;  %819 = vmatmul.msk.f32.gmra.mxu0 %vm212_vm1, %v209_v8 }
  0x45   : > { %828 = vmatmul.msk.f32.gmra.mxu1 %vm212_vm1, %v290_v9 }
  0x4b   : > { %845 = vmatmul.msk.f32.gmra.mxu3 %vm212_vm1, %v996_v15 }
  0x4c   : > { %877 = vmatmul.msk.f32.vlgmr.msrb.gmra.mxu2 %vm212_vm1, %v1016_v24  ;;  %857 = vmatmul.msk.f32.vlgmr.msrb.gmra.mxu0 %vm212_vm1, %v1019_v25 }
  0x4d   : > { %866 = vmatmul.msk.f32.vlgmr.msrb.gmra.mxu1 %vm212_vm1, %v1022_v26 }
  0x53   : > { %846 = vmatmul.msk.f32.gmra.mxu3 %vm212_vm1, %v1011_v23 }
  0x54   : > { %878 = vmatmul.msk.f32.gmra.mxu2 %vm212_vm1, %v1040_v32  ;;  %858 = vmatmul.msk.f32.gmra.mxu0 %vm212_vm1, %v1043_v33 }
  0x55   : > { %867 = vmatmul.msk.f32.gmra.mxu1 %vm212_vm1, %v1046_v34 }
  0x5b   : > { %847 = vmatmul.msk.f32.gmra.mxu3 %vm212_vm1, %v1049_v35 }
  0x5c   : > { %879 = vmatmul.msk.f32.gmra.mxu2 %vm212_vm1, %v1071_v42  ;;  %859 = vmatmul.msk.f32.gmra.mxu0 %vm212_vm1, %v1074_v43 }
  0x5d   : > { %868 = vmatmul.msk.f32.gmra.mxu1 %vm212_vm1, %v1077_v44 }
  0x63   : > { %848 = vmatmul.msk.f32.gmra.mxu3 %vm212_vm1, %v1080_v45 }
  0x64   : > { %880 = vmatmul.msk.f32.gmra.mxu2 %vm212_vm1, %v367_v51  ;;  %860 = vmatmul.msk.f32.gmra.mxu0 %vm212_vm1, %v203_v52 }
  0x65   : > { %869 = vmatmul.msk.f32.gmra.mxu1 %vm212_vm1, %v284_v53 }
  0x6b   : > { %849 = vmatmul.msk.f32.gmra.mxu3 %vm212_vm1, %v176_v54 }
  0x6c   : > { %881 = vmatmul.msk.f32.gmra.mxu2 %vm212_vm1, %v369_v61  ;;  %861 = vmatmul.msk.f32.gmra.mxu0 %vm212_vm1, %v205_v62 }
  0x6d   : > { %870 = vmatmul.msk.f32.gmra.mxu1 %vm212_vm1, %v286_v63 }
  0x73   : > { %850 = vmatmul.msk.f32.gmra.mxu3 %vm212_vm1, %v177_v0 }
  0x74   : > { %882 = vmatmul.msk.f32.gmra.mxu2 %vm212_vm1, %v371_v4  ;;  %862 = vmatmul.msk.f32.gmra.mxu0 %vm212_vm1, %v207_v5 }
  0x75   : > { %871 = vmatmul.msk.f32.gmra.mxu1 %vm212_vm1, %v288_v6 }
  0x7b   : > { %851 = vmatmul.msk.f32.gmra.mxu3 %vm212_vm1, %v983_v10 }
  0x7c   : > { %883 = vmatmul.msk.f32.gmra.mxu2 %vm212_vm1, %v373_v7  ;;  %863 = vmatmul.msk.f32.gmra.mxu0 %vm212_vm1, %v209_v8 }
  0x7d   : > { %872 = vmatmul.msk.f32.gmra.mxu1 %vm212_vm1, %v290_v9 }
  0x83   : > { %852 = vmatmul.msk.f32.gmra.mxu3 %vm212_vm1, %v986_v11 }
  0x84   : > { %884 = vmatmul.msk.f32.gmra.mxu2 %vm212_vm1, %v375_v60  ;;  %864 = vmatmul.msk.f32.gmra.mxu0 %vm212_vm1, %v1008_v22 }
  0x85   : > { %873 = vmatmul.msk.f32.gmra.mxu1 %vm212_vm1, %v1068_v41 }
  0x8c   : > { %885 = vmatmul.msk.f32.gmra.mxu2 %vm212_vm1, %v1109_v56  ;;  %865 = vmatmul.msk.f32.gmra.mxu0 %vm212_vm1, %v993_v14 }
  0x8d   : > { %874 = vmatmul.msk.f32.gmra.mxu1 %vm212_vm1, %v1059_v37 }
  0x91   : > { %v248_v10 = vpop.f32.mrf.mxu0 }
  0x92   : > { %v328_v12 = vpop.f32.mrf.mxu1 }
  0x93   : > { %v329_v11 = vadd.f32 %v328_v12, %v248_v10 }
  0x96   : > { %v269_v13 = vpop.f32.mrf.mxu3 }
  0x97   : > { %v411_v15 = vpop.f32.mrf.mxu2 }
  0x98   : > { %v1195_v16 = vadd.f32 %v411_v15, %v329_v11 }
  0x99   : > { %v251_v17 = vpop.f32.mrf.mxu0 }
  0x9a   : > { %v331_v18 = vpop.f32.mrf.mxu1 }
  0x9b   : > { %v332_v19 = vadd.f32 %v331_v18, %v251_v17 }
  0x9e   : > { %v272_v20 = vpop.f32.mrf.mxu3 }
  0x9f   : > { %v414_v21 = vpop.f32.mrf.mxu2 }
  0xa0   : > { %v1197_v22 = vadd.f32 %v414_v21, %v332_v19 }
  0xa1   : > { %v254_v23 = vpop.f32.mrf.mxu0 }
  0xa2   : > { %v334_v24 = vpop.f32.mrf.mxu1 }
  0xa3   : > { %v335_v14 = vadd.f32 %v334_v24, %v254_v23 }
  0xa6   : > { %v349_v25 = vpop.f32.mrf.mxu3 }
  0xa7   : > { %v350_v26 = vadd.f32 %v349_v25, %v269_v13  ;;  %v417_v27 = vpop.f32.mrf.mxu2 }
  0xa8   : > { %v1199_v28 = vadd.f32 %v417_v27, %v335_v14 }
  0xa9   : > { %v257_v29 = vpop.f32.mrf.mxu0 }
  0xaa   : > { %v337_v30 = vpop.f32.mrf.mxu1 }
  0xab   : > { %v338_v31 = vadd.f32 %v337_v30, %v257_v29 }
  0xae   : > { %v352_v32 = vpop.f32.mrf.mxu3 }
  0xaf   : > { %v353_v33 = vadd.f32 %v352_v32, %v272_v20  ;;  %v420_v34 = vpop.f32.mrf.mxu2 }
  0xb0   : > { %v1201_v35 = vadd.f32 %v420_v34, %v338_v31 }
  0xb1   : > { %v260_v36 = vpop.f32.mrf.mxu0 }
  0xb2   : > { %v340_v37 = vpop.f32.mrf.mxu1 }
  0xb3   : > { %v341_v38 = vadd.f32 %v340_v37, %v260_v36 }
  0xb6   : > { %v432_v39 = vpop.f32.mrf.mxu3 }
  0xb7   : > { %v423_v40 = vpop.f32.mrf.mxu2  ;;  %v1203_v41 = vadd.f32 %v432_v39, %v350_v26 }
  0xb8   : > { %v1205_v42 = vadd.f32 %v423_v40, %v341_v38 }
  0xb9   : > { %v263_v43 = vpop.f32.mrf.mxu0 }
  0xba   : > { %v343_v44 = vpop.f32.mrf.mxu1 }
  0xbb   : > { %v344_v45 = vadd.f32 %v343_v44, %v263_v43 }
  0xbe   : > { %v435_v46 = vpop.f32.mrf.mxu3 }
  0xbf   : > { %v426_v47 = vpop.f32.mrf.mxu2  ;;  %v1207_v48 = vadd.f32 %v435_v46, %v353_v33 }
  0xc0   : > { %v1209_v49 = vadd.f32 %v426_v47, %v344_v45  ;;  %v904_v47 = vld [vmem:[%s1272_s2] ss:$0 sm:$0xff] }
  0xc1   : > { %v266_v50 = vpop.f32.mrf.mxu0 }
  0xc2   : > { %v346_v51 = vpop.f32.mrf.mxu1 }
  0xc3   : > { %v347_v52 = vadd.f32 %v346_v51, %v266_v50 }
  0xc6   : > { %v485_v40 = vpop.f32.mrf.mxu3 }
  0xc7   : > { %v429_v53 = vpop.f32.mrf.mxu2  ;;  %v512_v50 = vadd.f32 %v485_v40, %v1195_v16 }
  0xc8   : > { %v1211_v54 = vadd.f32 %v429_v53, %v347_v52 }
  0xc9   : > { %v544_v55 = vpop.f32.mrf.mxu0 }
  0xca   : > { %v588_v56 = vpop.f32.mrf.mxu1 }
  0xcb   : > { %v589_v57 = vadd.f32 %v588_v56, %v544_v55 }
  0xce   : > { %v488_v43 = vpop.f32.mrf.mxu3 }
  0xcf   : > { %v635_v58 = vpop.f32.mrf.mxu2  ;;  %v513_v56 = vadd.f32 %v488_v43, %v1197_v22 }
  0xd0   : > { %v662_v59 = vadd.f32 %v635_v58, %v589_v57 }
  0xd1   : > { %v547_v60 = vpop.f32.mrf.mxu0 }
  0xd2   : > { %680 = vrot.lane.b32.xlu0 %v662_v59, %s913_s21  ;;  %v591_v61 = vpop.f32.mrf.mxu1 }
  0xd3   : > { %v592_v62 = vadd.f32 %v591_v61, %v547_v60 }
  0xd6   : > { %v491_v44 = vpop.f32.mrf.mxu3 }
  0xd7   : > { %v638_v63 = vpop.f32.mrf.mxu2 }
  0xd8   : > { %v663_v0 = vadd.f32 %v638_v63, %v592_v62 }
  0xd9   : > { %v550_v1 = vpop.f32.mrf.mxu0 }
  0xda   : > { %682 = vrot.lane.b32.xlu0 %v663_v0, %s913_s21  ;;  %v594_v2 = vpop.f32.mrf.mxu1 }
  0xdb   : > { %v595_v3 = vadd.f32 %v594_v2, %v550_v1  ;;  %v514_v2 = vadd.f32 %v491_v44, %v1199_v28 }
  0xde   : > { %v494_v45 = vpop.f32.mrf.mxu3 }
  0xdf   : > { %v641_v4 = vpop.f32.mrf.mxu2  ;;  %v515_v28 = vadd.f32 %v494_v45, %v1201_v35 }
  0xe0   : > { %v664_v5 = vadd.f32 %v641_v4, %v595_v3 }
  0xe1   : > { %v553_v6 = vpop.f32.mrf.mxu0 }
  0xe2   : > { %684 = vrot.lane.b32.xlu1 %v664_v5, %s913_s21  ;;  %v597_v7 = vpop.f32.mrf.mxu1 }
  0xe3   : > { %v598_v8 = vadd.f32 %v597_v7, %v553_v6 }
  0xe6   : > { %v497_v46 = vpop.f32.mrf.mxu3 }
  0xe7   : > { %v644_v9 = vpop.f32.mrf.mxu2  ;;  %v516_v16 = vadd.f32 %v497_v46, %v1205_v42 }
  0xe8   : > { %v665_v10 = vadd.f32 %v644_v9, %v598_v8 }
  0xe9   : > { %v556_v12 = vpop.f32.mrf.mxu0 }
  0xea   : > { %686 = vrot.lane.b32.xlu1 %v665_v10, %s913_s21  ;;  %v600_v11 = vpop.f32.mrf.mxu1 }
  0xeb   : > { %v601_v13 = vadd.f32 %v600_v11, %v556_v12 }
  0xee   : > { %v500_v57 = vpop.f32.mrf.mxu3 }
  0xef   : > { %v647_v15 = vpop.f32.mrf.mxu2  ;;  %v517_v22 = vadd.f32 %v500_v57, %v1209_v49 }
  0xf0   : > { %v666_v17 = vadd.f32 %v647_v15, %v601_v13 }
  0xf1   : > { %v559_v18 = vpop.f32.mrf.mxu0 }
  0xf2   : > { %688 = vrot.lane.b32.xlu2 %v666_v17, %s913_s21  ;;  %v603_v19 = vpop.f32.mrf.mxu1 }
  0xf3   : > { %v604_v20 = vadd.f32 %v603_v19, %v559_v18 }
  0xf6   : > { %v503_v6 = vpop.f32.mrf.mxu3 }
  0xf7   : > { %v650_v21 = vpop.f32.mrf.mxu2 }
  0xf8   : > { %v667_v23 = vadd.f32 %v650_v21, %v604_v20 }
  0xf9   : > { %v562_v24 = vpop.f32.mrf.mxu0 }
  0xfa   : > { %690 = vrot.lane.b32.xlu2 %v667_v23, %s913_s21  ;;  %v606_v14 = vpop.f32.mrf.mxu1  ;;  %v518_v23 = vadd.f32 %v503_v6, %v1211_v54 }
  0xfb   : > { %v607_v25 = vadd.f32 %v606_v14, %v562_v24 }
  0xfe   : > { %v506_v11 = vpop.f32.mrf.mxu3 }
  0xff   : > { %v653_v26 = vpop.f32.mrf.mxu2 }
 0x100   : > { %v668_v27 = vadd.f32 %v653_v26, %v607_v25 }
 0x101   : > { %v565_v29 = vpop.f32.mrf.mxu0 }
 0x102   : > { %692 = vrot.lane.b32.xlu0 %v668_v27, %s913_s21  ;;  %v609_v30 = vpop.f32.mrf.mxu1  ;;  %v519_v27 = vadd.f32 %v506_v11, %v1203_v41 }
 0x103   : > { %v610_v31 = vadd.f32 %v609_v30, %v565_v29 }
 0x106   : > { %v509_v17 = vpop.f32.mrf.mxu3 }
 0x107   : > { %v656_v32 = vpop.f32.mrf.mxu2  ;;  %v520_v18 = vadd.f32 %v509_v17, %v1207_v48 }
 0x108   : > { %v669_v33 = vadd.f32 %v656_v32, %v610_v31 }
 0x109   : > { %v568_v34 = vpop.f32.mrf.mxu0 }
 0x10a   : > { %694 = vrot.lane.b32.xlu1 %v669_v33, %s913_s21  ;;  %v612_v36 = vpop.f32.mrf.mxu1 }
 0x10b   : > { %v613_v37 = vadd.f32 %v612_v36, %v568_v34 }
 0x10f   : > { %v659_v38 = vpop.f32.mrf.mxu2 }
 0x110   : > { %v670_v39 = vadd.f32 %v659_v38, %v613_v37 }
 0x112   : > { %696 = vrot.lane.b32.xlu2 %v670_v39, %s913_s21 }
 0x144   : > { %v681_v51 = vpop.permute.xlu0 %680 }
 0x145   : > { %v707_v52 = vsel %vm212_vm1, %v512_v50, %v681_v51 }
 0x146   : > { %v720_v53 = vadd.f32 %v904_v47, %v707_v52 }
 0x148   : > { %v729_v55 = vmax.f32 %v720_v53, 0.0 }
 0x14a   : > { %739 = vst.msk [vmem:[%s1232_s26] sm:$0xff] %vm738_vm4, %v729_v55 }
 0x14c   : > { %v683_v58 = vpop.permute.xlu0 %682  ;;  %v689_v59 = vpop.permute.xlu2 %688 }
 0x14d   : > { %v708_v60 = vsel %vm212_vm1, %v513_v56, %v683_v58  ;;  %v711_v61 = vsel %vm212_vm1, %v516_v16, %v689_v59 }
 0x14e   : > { %v721_v62 = vadd.f32 %v904_v47, %v708_v60  ;;  %v724_v63 = vadd.f32 %v904_v47, %v711_v61 }
 0x150   : > { %v730_v0 = vmax.f32 %v721_v62, 0.0  ;;  %v733_v1 = vmax.f32 %v724_v63, 0.0 }
 0x152   : > { %740 = vst.msk [vmem:[%s1232_s26 + $0x8] sm:$0xff] %vm738_vm4, %v730_v0 }
 0x153   : > { %743 = vst.msk [vmem:[%s1232_s26 + $0x20] sm:$0xff] %vm738_vm4, %v733_v1 }
 0x154   : > { %v685_v42 = vpop.permute.xlu1 %684  ;;  %v691_v3 = vpop.permute.xlu2 %690 }
 0x155   : > { %v709_v4 = vsel %vm212_vm1, %v514_v2, %v685_v42  ;;  %v712_v5 = vsel %vm212_vm1, %v517_v22, %v691_v3 }
 0x156   : > { %v722_v7 = vadd.f32 %v904_v47, %v709_v4  ;;  %v725_v8 = vadd.f32 %v904_v47, %v712_v5 }
 0x158   : > { %v731_v9 = vmax.f32 %v722_v7, 0.0  ;;  %v734_v10 = vmax.f32 %v725_v8, 0.0 }
 0x15a   : > { %741 = vst.msk [vmem:[%s1232_s26 + $0x10] sm:$0xff] %vm738_vm4, %v731_v9 }
 0x15b   : > { %744 = vst.msk [vmem:[%s1232_s26 + $0x28] sm:$0xff] %vm738_vm4, %v734_v10 }
 0x15c   : > { %v687_v49 = vpop.permute.xlu1 %686 }
 0x15d   : > { %v710_v12 = vsel %vm212_vm1, %v515_v28, %v687_v49 }
 0x15e   : > { %v723_v13 = vadd.f32 %v904_v47, %v710_v12 }
 0x160   : > { %v732_v15 = vmax.f32 %v723_v13, 0.0 }
 0x162   : > { %742 = vst.msk [vmem:[%s1232_s26 + $0x18] sm:$0xff] %vm738_vm4, %v732_v15 }
 0x16c   : > { %v697_v19 = vpop.permute.xlu2 %696 }
 0x16d   : > { %v715_v20 = vsel %vm212_vm1, %v520_v18, %v697_v19 }
 0x16e   : > { %v728_v21 = vadd.f32 %v904_v47, %v715_v20 }
 0x170   : > { %v737_v35 = vmax.f32 %v728_v21, 0.0 }
 0x172   : > { %748 = vst.msk [vmem:[%s1232_s26 + $0x40] sm:$0x1] %vm747_vm5, %v737_v35 }
 0x174   : > { %v693_v24 = vpop.permute.xlu0 %692 }
 0x175   : > { %v713_v14 = vsel %vm212_vm1, %v518_v23, %v693_v24 }
 0x176   : > { %v726_v25 = vadd.f32 %v904_v47, %v713_v14 }
 0x178   : > { %v735_v26 = vmax.f32 %v726_v25, 0.0 }
 0x17a   : > { %745 = vst.msk [vmem:[%s1232_s26 + $0x30] sm:$0xff] %vm738_vm4, %v735_v26 }
 0x17c   : > { %v695_v48 = vpop.permute.xlu1 %694 }
 0x17d   : > { %v714_v29 = vsel %vm212_vm1, %v519_v27, %v695_v48 }
 0x17e   : > { %v727_v30 = vadd.f32 %v904_v47, %v714_v29 }
 0x180   : > { %v736_v31 = vmax.f32 %v727_v30, 0.0 }
 0x182   : > { %746 = vst.msk [vmem:[%s1232_s26 + $0x38] sm:$0xff] %vm738_vm4, %v736_v31 }
 0x183 PF: > { %s13_s12 = sadd.s32 1, %s911_s12  }
 0x184   : > { %p10_p4 = scmp.ge.s32.totalorder %s13_s12, 4  }
 0x186   :  { %12 = sbr.rel (!%p10_p4) target bundleno = 1 (0x1), region = 68 }

// kernel: decoder_forward.10
= control target key start
LH: loop header
LB: loop body
LE: loop exit
PB: predicated region body
PF: predicated region fallthrough
CT: control target
= control target key end

     0   :  { %s650_s12 = smov 0   ;;  %s830_s0 = inlined_call_operand.vmem [shape: f32[2,130,16], index: 0, kind: input, shape index: {}]   ;;  %s831_s1 = inlined_call_operand.vmem [shape: f32[2,16,16], index: 1, kind: input, shape index: {}]   ;;  %s832_s2 = inlined_call_operand.vmem [shape: f32[1,32], index: 2, kind: input, shape index: {}]   ;;  %s833_s3 = inlined_call_operand.vmem [shape: f32[2,130,32], index: 3, kind: output, shape index: {}]  }
   0x1 LB: > { %s561_s13 = sadd.s32 4294967295, %s627_s12   ;;  %p565_p0 = scmp.ge.s32.totalorder %s627_s12, 1  ;;  %s627_s12 = sphi %s650_s12, %s13_s12  }
   0x2   : > { %p137_p1 = scmp.lt.s32.totalorder %s627_s12, 3 }
   0x4   : > { %p138_p2 = pnand %p565_p0, %p137_p1 }
   0x5   : > { %p161_p3 = scmp.lt.s32.totalorder (!%p138_p2), %s561_s13, 1  ;;  %s629_s26 = smov (!%p138_p2), 16  }
   0x6   : > { %141 = sbr.rel (%p138_p2) target bundleno = 325 (0x145), region = 32 }
   0xb   : > { %v586_v0 = vld [vmem:[%s831_s1 + $0x18] sm:$0xff]  ;;  %v585_v1 = vld [vmem:[%s831_s1 + $0x10] sm:$0xff]  ;;  %s835_s13 = smov (!%p161_p3, %s561_s13), 1  ;;  %vm190_vm0 = vcmask 130048   ;;  %v189_v12 = vld [vmem:[%s831_s1 + $0x8] sm:$0xff]  ;;  %vm487_vm1 = vcmask 261120  }
   0xc   : > { %327 = vmatpush.msra.mxu1 %v586_v0  ;;  %608 = vmatpush.msra.mxu3 %v586_v0  ;;  %s610_s18 = smul.u32 136, %s835_s13  ;;  %v188_v13 = vld [vmem:[%s831_s1] sm:$0xff]  ;;  %vm504_vm2 = vcmask 254976  }
   0xd   : > { %256 = vmatpush.msra.mxu0 %v189_v12  ;;  %606 = vmatpush.msra.mxu2 %v189_v12  ;;  %v751_v45 = vld [vmem:[%s832_s2] ss:$0 sm:$0xff] }
   0xe   : > { %328 = vmatpush.msra.mxu1 %v585_v1  ;;  %609 = vmatpush.msra.mxu3 %v585_v1  ;;  %s672_s21 = scalar_lea.vmem %s830_s0, %s610_s18  ;;  %s758_s4 = scalar_lea.vmem %s833_s3, %s610_s18 }
   0xf   : > { %v171_v2 = vld [vmem:[%s672_s21] sm:$0xff]  ;;  %v180_v3 = vld [vmem:[%s672_s21 + $0x48] sm:$0xff]  ;;  %v181_v5 = vld [vmem:[%s672_s21 + $0x50] sm:$0xff]  ;;  %257 = vmatpush.msra.mxu0 %v188_v13  ;;  %607 = vmatpush.msra.mxu2 %v188_v13 }
  0x10   : > { %587 = vmatmul.msk.f32.vlgmr.msra.gmra.mxu1 %vm190_vm0, %v171_v2  ;;  %596 = vmatmul.msk.f32.vlgmr.msra.gmra.mxu3 %vm190_vm0, %v180_v3  ;;  %v172_v4 = vld [vmem:[%s672_s21 + $0x8] sm:$0xff]  ;;  %v173_v6 = vld [vmem:[%s672_s21 + $0x10] sm:$0xff]  ;;  %v182_v7 = vld [vmem:[%s672_s21 + $0x58] sm:$0xff] }
  0x11   : > { %v174_v8 = vld [vmem:[%s672_s21 + $0x18] sm:$0xff]  ;;  %v183_v9 = vld [vmem:[%s672_s21 + $0x60] sm:$0xff]  ;;  %v184_v11 = vld [vmem:[%s672_s21 + $0x68] sm:$0xff]  ;;  %568 = vmatmul.msk.f32.vlgmr.msra.gmra.mxu0 %vm190_vm0, %v171_v2  ;;  %577 = vmatmul.msk.f32.vlgmr.msra.gmra.mxu2 %vm190_vm0, %v180_v3 }
  0x12   : > { %v175_v10 = vld [vmem:[%s672_s21 + $0x20] sm:$0xff]  ;;  %v176_v14 = vld [vmem:[%s672_s21 + $0x28] sm:$0xff]  ;;  %v185_v15 = vld [vmem:[%s672_s21 + $0x70] sm:$0xff] }
  0x13   : > { %v177_v16 = vld [vmem:[%s672_s21 + $0x30] sm:$0xff]  ;;  %v186_v17 = vld [vmem:[%s672_s21 + $0x78] sm:$0xff]  ;;  %v187_v19 = vld [vmem:[%s672_s21 + $0x80] sm:$0x3] }
  0x14   : > { %v178_v18 = vld [vmem:[%s672_s21 + $0x38] sm:$0xff]  ;;  %v179_v20 = vld [vmem:[%s672_s21 + $0x40] sm:$0xff] }
  0x18   : > { %588 = vmatmul.msk.f32.gmra.mxu1 %vm190_vm0, %v172_v4  ;;  %597 = vmatmul.msk.f32.gmra.mxu3 %vm190_vm0, %v181_v5 }
  0x19   : > { %569 = vmatmul.msk.f32.gmra.mxu0 %vm190_vm0, %v172_v4  ;;  %578 = vmatmul.msk.f32.gmra.mxu2 %vm190_vm0, %v181_v5 }
  0x20   : > { %589 = vmatmul.msk.f32.gmra.mxu1 %vm190_vm0, %v173_v6  ;;  %598 = vmatmul.msk.f32.gmra.mxu3 %vm190_vm0, %v182_v7 }
  0x21   : > { %570 = vmatmul.msk.f32.gmra.mxu0 %vm190_vm0, %v173_v6  ;;  %579 = vmatmul.msk.f32.gmra.mxu2 %vm190_vm0, %v182_v7 }
  0x28   : > { %590 = vmatmul.msk.f32.gmra.mxu1 %vm190_vm0, %v174_v8  ;;  %599 = vmatmul.msk.f32.gmra.mxu3 %vm190_vm0, %v183_v9 }
  0x29   : > { %571 = vmatmul.msk.f32.gmra.mxu0 %vm190_vm0, %v174_v8  ;;  %580 = vmatmul.msk.f32.gmra.mxu2 %vm190_vm0, %v183_v9 }
  0x30   : > { %591 = vmatmul.msk.f32.gmra.mxu1 %vm190_vm0, %v175_v10  ;;  %600 = vmatmul.msk.f32.gmra.mxu3 %vm190_vm0, %v184_v11 }
  0x31   : > { %572 = vmatmul.msk.f32.gmra.mxu0 %vm190_vm0, %v175_v10  ;;  %581 = vmatmul.msk.f32.gmra.mxu2 %vm190_vm0, %v184_v11 }
  0x38   : > { %592 = vmatmul.msk.f32.gmra.mxu1 %vm190_vm0, %v176_v14  ;;  %601 = vmatmul.msk.f32.gmra.mxu3 %vm190_vm0, %v185_v15 }
  0x39   : > { %573 = vmatmul.msk.f32.gmra.mxu0 %vm190_vm0, %v176_v14  ;;  %582 = vmatmul.msk.f32.gmra.mxu2 %vm190_vm0, %v185_v15 }
  0x40   : > { %593 = vmatmul.msk.f32.gmra.mxu1 %vm190_vm0, %v177_v16  ;;  %602 = vmatmul.msk.f32.gmra.mxu3 %vm190_vm0, %v186_v17 }
  0x41   : > { %574 = vmatmul.msk.f32.gmra.mxu0 %vm190_vm0, %v177_v16  ;;  %583 = vmatmul.msk.f32.gmra.mxu2 %vm190_vm0, %v186_v17 }
  0x48   : > { %594 = vmatmul.msk.f32.gmra.mxu1 %vm190_vm0, %v178_v18  ;;  %603 = vmatmul.msk.f32.gmra.mxu3 %vm190_vm0, %v187_v19 }
  0x49   : > { %575 = vmatmul.msk.f32.gmra.mxu0 %vm190_vm0, %v178_v18  ;;  %584 = vmatmul.msk.f32.gmra.mxu2 %vm190_vm0, %v187_v19 }
  0x50   : > { %595 = vmatmul.msk.f32.gmra.mxu1 %vm190_vm0, %v179_v20 }
  0x51   : > { %576 = vmatmul.msk.f32.gmra.mxu0 %vm190_vm0, %v179_v20 }
  0x8d   : > { %v330_v21 = vpop.f32.mrf.mxu1 }
  0x8e   : > { %398 = vrot.lane.b32.xlu0 %v330_v21, %s629_s26  ;;  %v259_v38 = vpop.f32.mrf.mxu0 }
  0x93   : > { %v357_v22 = vpop.f32.mrf.mxu3 }
  0x94   : > { %v286_v40 = vpop.f32.mrf.mxu2 }
  0x95   : > { %v333_v23 = vpop.f32.mrf.mxu1 }
  0x96   : > { %416 = vrot.lane.b32.xlu0 %v357_v22, %s629_s26  ;;  %v262_v39 = vpop.f32.mrf.mxu0 }
  0x9b   : > { %v360_v24 = vpop.f32.mrf.mxu3 }
  0x9c   : > { %418 = vrot.lane.b32.xlu1 %v360_v24, %s629_s26  ;;  %v289_v42 = vpop.f32.mrf.mxu2 }
  0x9d   : > { %v336_v25 = vpop.f32.mrf.mxu1 }
  0x9e   : > { %400 = vrot.lane.b32.xlu0 %v333_v23, %s629_s26  ;;  %v265_v41 = vpop.f32.mrf.mxu0 }
  0xa3   : > { %v363_v26 = vpop.f32.mrf.mxu3 }
  0xa4   : > { %402 = vrot.lane.b32.xlu1 %v336_v25, %s629_s26  ;;  %420 = vrot.lane.b32.xlu2 %v363_v26, %s629_s26  ;;  %v292_v44 = vpop.f32.mrf.mxu2 }
  0xa5   : > { %v339_v27 = vpop.f32.mrf.mxu1 }
  0xa6   : > { %v268_v43 = vpop.f32.mrf.mxu0 }
  0xab   : > { %v366_v28 = vpop.f32.mrf.mxu3 }
  0xac   : > { %404 = vrot.lane.b32.xlu1 %v339_v27, %s629_s26  ;;  %422 = vrot.lane.b32.xlu0 %v366_v28, %s629_s26  ;;  %v295_v7 = vpop.f32.mrf.mxu2 }
  0xad   : > { %v342_v29 = vpop.f32.mrf.mxu1 }
  0xae   : > { %406 = vrot.lane.b32.xlu2 %v342_v29, %s629_s26  ;;  %v271_v50 = vpop.f32.mrf.mxu0 }
  0xb3   : > { %v369_v30 = vpop.f32.mrf.mxu3 }
  0xb4   : > { %424 = vrot.lane.b32.xlu1 %v369_v30, %s629_s26  ;;  %v298_v17 = vpop.f32.mrf.mxu2 }
  0xb5   : > { %v345_v31 = vpop.f32.mrf.mxu1 }
  0xb6   : > { %408 = vrot.lane.b32.xlu2 %v345_v31, %s629_s26  ;;  %v274_v59 = vpop.f32.mrf.mxu0 }
  0xbb   : > { %v372_v32 = vpop.f32.mrf.mxu3 }
  0xbc   : > { %v301_v24 = vpop.f32.mrf.mxu2 }
  0xbd   : > { %v348_v33 = vpop.f32.mrf.mxu1 }
  0xbe   : > { %410 = vrot.lane.b32.xlu0 %v348_v33, %s629_s26  ;;  %v277_v5 = vpop.f32.mrf.mxu0 }
  0xc3   : > { %v375_v34 = vpop.f32.mrf.mxu3 }
  0xc5   : > { %v351_v35 = vpop.f32.mrf.mxu1 }
  0xc6   : > { %428 = vrot.lane.b32.xlu0 %v375_v34, %s629_s26  ;;  %412 = vrot.lane.b32.xlu1 %v351_v35, %s629_s26  ;;  %v280_v10 = vpop.f32.mrf.mxu0 }
  0xcb   : > { %v378_v36 = vpop.f32.mrf.mxu3 }
  0xcd   : > { %v354_v37 = vpop.f32.mrf.mxu1 }
  0xce   : > { %430 = vrot.lane.b32.xlu1 %v378_v36, %s629_s26  ;;  %414 = vrot.lane.b32.xlu2 %v354_v37, %s629_s26  ;;  %v283_v19 = vpop.f32.mrf.mxu0 }
  0xd6   : > { %426 = vrot.lane.b32.xlu2 %v372_v32, %s629_s26  ;;  %v304_v32 = vpop.f32.mrf.mxu2 }
  0xfe   : > { %v421_v46 = vpop.permute.xlu2 %420 }
  0xff   : > { %v460_v47 = vsel %vm190_vm0, %v292_v44, %v421_v46 }
 0x100   : > { %v481_v48 = vadd.f32 %v751_v45, %v460_v47  ;;  %v399_v49 = vpop.permute.xlu0 %398 }
 0x101   : > { %v449_v51 = vsel %vm190_vm0, %v259_v38, %v399_v49 }
 0x102   : > { %499 = vst.msk [vmem:[%s758_s4 + $0x58] sm:$0xff] %vm487_vm1, %v481_v48  ;;  %v470_v52 = vadd.f32 %v751_v45, %v449_v51 }
 0x104   : > { %488 = vst.msk [vmem:[%s758_s4] sm:$0xff] %vm487_vm1, %v470_v52 }
 0x108   : > { %v417_v53 = vpop.permute.xlu0 %416  ;;  %v407_v54 = vpop.permute.xlu2 %406 }
 0x109   : > { %v458_v55 = vsel %vm190_vm0, %v286_v40, %v417_v53  ;;  %v453_v56 = vsel %vm190_vm0, %v271_v50, %v407_v54 }
 0x10a   : > { %v479_v57 = vadd.f32 %v751_v45, %v458_v55  ;;  %v474_v58 = vadd.f32 %v751_v45, %v453_v56 }
 0x10c   : > { %497 = vst.msk [vmem:[%s758_s4 + $0x48] sm:$0xff] %vm487_vm1, %v479_v57 }
 0x10d   : > { %492 = vst.msk [vmem:[%s758_s4 + $0x20] sm:$0xff] %vm487_vm1, %v474_v58 }
 0x10e   : > { %v419_v60 = vpop.permute.xlu1 %418 }
 0x10f   : > { %v459_v61 = vsel %vm190_vm0, %v289_v42, %v419_v60 }
 0x110   : > { %v480_v62 = vadd.f32 %v751_v45, %v459_v61  ;;  %v401_v63 = vpop.permute.xlu0 %400  ;;  %v409_v0 = vpop.permute.xlu2 %408 }
 0x111   : > { %v450_v1 = vsel %vm190_vm0, %v262_v39, %v401_v63  ;;  %v454_v2 = vsel %vm190_vm0, %v274_v59, %v409_v0  ;;  %v307_v39 = vpop.f32.mrf.mxu2 }
 0x112   : > { %498 = vst.msk [vmem:[%s758_s4 + $0x50] sm:$0xff] %vm487_vm1, %v480_v62  ;;  %v471_v3 = vadd.f32 %v751_v45, %v450_v1  ;;  %v475_v4 = vadd.f32 %v751_v45, %v454_v2 }
 0x114   : > { %489 = vst.msk [vmem:[%s758_s4 + $0x8] sm:$0xff] %vm487_vm1, %v471_v3 }
 0x115   : > { %493 = vst.msk [vmem:[%s758_s4 + $0x28] sm:$0xff] %vm487_vm1, %v475_v4 }
 0x116   : > { %v403_v6 = vpop.permute.xlu1 %402 }
 0x117   : > { %v451_v8 = vsel %vm190_vm0, %v265_v41, %v403_v6 }
 0x118   : > { %v472_v9 = vadd.f32 %v751_v45, %v451_v8 }
 0x11a   : > { %490 = vst.msk [vmem:[%s758_s4 + $0x10] sm:$0xff] %vm487_vm1, %v472_v9 }
 0x11e   : > { %v405_v11 = vpop.permute.xlu1 %404  ;;  %v423_v12 = vpop.permute.xlu0 %422 }
 0x11f   : > { %v452_v13 = vsel %vm190_vm0, %v268_v43, %v405_v11  ;;  %v461_v14 = vsel %vm190_vm0, %v295_v7, %v423_v12 }
 0x120   : > { %v473_v15 = vadd.f32 %v751_v45, %v452_v13  ;;  %v482_v16 = vadd.f32 %v751_v45, %v461_v14 }
 0x122   : > { %491 = vst.msk [vmem:[%s758_s4 + $0x18] sm:$0xff] %vm487_vm1, %v473_v15 }
 0x123   : > { %500 = vst.msk [vmem:[%s758_s4 + $0x60] sm:$0xff] %vm487_vm1, %v482_v16 }
 0x126   : > { %v425_v18 = vpop.permute.xlu1 %424 }
 0x127   : > { %v462_v20 = vsel %vm190_vm0, %v298_v17, %v425_v18 }
 0x128   : > { %v483_v21 = vadd.f32 %v751_v45, %v462_v20  ;;  %v415_v22 = vpop.permute.xlu2 %414 }
 0x129   : > { %v457_v23 = vsel %vm190_vm0, %v283_v19, %v415_v22 }
 0x12a   : > { %501 = vst.msk [vmem:[%s758_s4 + $0x68] sm:$0xff] %vm487_vm1, %v483_v21  ;;  %v478_v25 = vadd.f32 %v751_v45, %v457_v23 }
 0x12c   : > { %496 = vst.msk [vmem:[%s758_s4 + $0x40] sm:$0xff] %vm487_vm1, %v478_v25 }
 0x130   : > { %v411_v26 = vpop.permute.xlu0 %410  ;;  %v427_v27 = vpop.permute.xlu2 %426 }
 0x131   : > { %v455_v28 = vsel %vm190_vm0, %v277_v5, %v411_v26  ;;  %v463_v29 = vsel %vm190_vm0, %v301_v24, %v427_v27 }
 0x132   : > { %v476_v30 = vadd.f32 %v751_v45, %v455_v28  ;;  %v484_v31 = vadd.f32 %v751_v45, %v463_v29 }
 0x134   : > { %494 = vst.msk [vmem:[%s758_s4 + $0x30] sm:$0xff] %vm487_vm1, %v476_v30 }
 0x135   : > { %502 = vst.msk [vmem:[%s758_s4 + $0x70] sm:$0xff] %vm487_vm1, %v484_v31 }
 0x138   : > { %v429_v33 = vpop.permute.xlu0 %428  ;;  %v413_v34 = vpop.permute.xlu1 %412 }
 0x139   : > { %v464_v35 = vsel %vm190_vm0, %v304_v32, %v429_v33  ;;  %v456_v36 = vsel %vm190_vm0, %v280_v10, %v413_v34 }
 0x13a   : > { %v485_v37 = vadd.f32 %v751_v45, %v464_v35  ;;  %v477_v38 = vadd.f32 %v751_v45, %v456_v36 }
 0x13c   : > { %503 = vst.msk [vmem:[%s758_s4 + $0x78] sm:$0xff] %vm487_vm1, %v485_v37 }
 0x13d   : > { %495 = vst.msk [vmem:[%s758_s4 + $0x38] sm:$0xff] %vm487_vm1, %v477_v38 }
 0x140   : > { %v431_v40 = vpop.permute.xlu1 %430 }
 0x141   : > { %v465_v41 = vsel %vm190_vm0, %v307_v39, %v431_v40 }
 0x142   : > { %v486_v42 = vadd.f32 %v751_v45, %v465_v41 }
 0x144   : > { %505 = vst.msk [vmem:[%s758_s4 + $0x80] sm:$0x3] %vm504_vm2, %v486_v42 }
 0x145 PF: > { %s13_s12 = sadd.s32 1, %s627_s12  }
 0x146   : > { %p10_p4 = scmp.ge.s32.totalorder %s13_s12, 4  }
 0x148   :  { %12 = sbr.rel (!%p10_p4) target bundleno = 1 (0x1), region = 63 }

// kernel: decoder_forward.11
= control target key start
LH: loop header
LB: loop body
LE: loop exit
PB: predicated region body
PF: predicated region fallthrough
CT: control target
= control target key end

     0   :  { %s888_s12 = smov 0   ;;  %s1184_s0 = inlined_call_operand.vmem [shape: f32[2,262,16], index: 0, kind: input, shape index: {}]   ;;  %s1185_s1 = inlined_call_operand.vmem [shape: f32[7,16,8], index: 1, kind: input, shape index: {}]   ;;  %s1186_s2 = inlined_call_operand.vmem [shape: f32[1,16], index: 2, kind: input, shape index: {}]   ;;  %s1187_s3 = inlined_call_operand.vmem [shape: f32[2,64,16], index: 3, kind: output, shape index: {}]  }
   0x1 LB: > { %s763_s13 = sadd.s32 4294967295, %s865_s12   ;;  %p767_p0 = scmp.ge.s32.totalorder %s865_s12, 1  ;;  %s865_s12 = sphi %s888_s12, %s13_s12  }
   0x2   : > { %p137_p1 = scmp.lt.s32.totalorder %s865_s12, 3 }
   0x4   : > { %p138_p2 = pnand %p767_p0, %p137_p1 }
   0x5   : > { %p161_p3 = scmp.lt.s32.totalorder (!%p138_p2), %s763_s13, 1  ;;  %s867_s21 = smov (!%p138_p2), 8  }
   0x6   : > { %141 = sbr.rel (%p138_p2) target bundleno = 379 (0x17b), region = 32 }
   0xb   : > { %v772_v0 = vld [vmem:[%s1185_s1 + $0x28] sm:$0xff]  ;;  %v771_v2 = vld [vmem:[%s1185_s1 + $0x20] sm:$0xff]  ;;  %v830_v4 = vld [vmem:[%s1185_s1 + $0x58] sm:$0xff]  ;;  %s1189_s13 = smov (!%p161_p3, %s763_s13), 1  ;;  %vm194_vm0 = vcmask 1045504   ;;  %vm212_vm1 = vcmask 130048  }
   0xc   : > { %v790_v1 = vld [vmem:[%s1185_s1 + $0x48] sm:$0xff]  ;;  %842 = vmatpush.msra.mxu3 %v772_v0  ;;  %v789_v3 = vld [vmem:[%s1185_s1 + $0x40] sm:$0xff]  ;;  %243 = vmatpush.msra.mxu0 %v772_v0  ;;  %v812_v7 = vld [vmem:[%s1185_s1 + $0x38] sm:$0xff]  ;;  %s848_s5 = smul.u32 264, %s1189_s13  ;;  %vm348_vm2 = vcmask 1046528   ;;  %vm270_vm3 = vcmask 1044480  }
   0xd   : > { %396 = vmatpush.msra.mxu2 %v790_v1  ;;  %v181_v5 = vld [vmem:[%s1185_s1 + $0x8] sm:$0xff]  ;;  %v180_v6 = vld [vmem:[%s1185_s1] sm:$0xff]  ;;  %v810_v8 = vld [vmem:[%s1185_s1 + $0x18] sm:$0xff]  ;;  %vm671_vm4 = vcmask 64512   ;;  %s841_s24 = sshll.u32 %s1189_s13, 6 }
   0xe   : > { %318 = vmatpush.msra.mxu1 %v181_v5  ;;  %843 = vmatpush.msra.mxu3 %v771_v2  ;;  %v829_v9 = vld [vmem:[%s1185_s1 + $0x50] sm:$0xff]  ;;  %s938_s16 = scalar_lea.vmem %s1184_s0, %s848_s5  ;;  %v800_v49 = vld [vmem:[%s1185_s1 + $0x68] sm:$0xff]  ;;  %v799_v51 = vld [vmem:[%s1185_s1 + $0x60] sm:$0xff]  ;;  %s1149_s27 = scalar_lea.vmem %s1187_s3, %s841_s24 }
   0xf   : > { %397 = vmatpush.msra.mxu2 %v789_v3  ;;  %244 = vmatpush.msra.mxu0 %v771_v2  ;;  %v811_v10 = vld [vmem:[%s1185_s1 + $0x30] sm:$0xff]  ;;  %v944_v13 = vld [vmem:[%s938_s16 + $0x38] sm:$0xff]  ;;  %v947_v14 = vld [vmem:[%s938_s16] sm:$0xff] }
  0x10   : > { %319 = vmatpush.msra.mxu1 %v180_v6  ;;  %v809_v11 = vld [vmem:[%s1185_s1 + $0x10] sm:$0xff]  ;;  %844 = vmatpush.msrb.mxu3 %v181_v5  ;;  %v208_v16 = vrot.slane %v944_v13, 2  ;;  %v952_v17 = vld [vmem:[%s938_s16 + $0x8] sm:$0xff]  ;;  %v349_v18 = vrot.slane %v947_v14, 1  ;;  %v195_v19 = vrot.slane %v947_v14, 2  ;;  %v271_v22 = vrot.slane %v947_v14, 3 }
  0x11   : > { %604 = vmatpush.msrb.mxu2 %v830_v4  ;;  %519 = vmatpush.msrb.mxu0 %v812_v7  ;;  %v941_v12 = vld [vmem:[%s938_s16 + $0x30] sm:$0xff]  ;;  %v350_v20 = vrot.slane %v952_v17, 1  ;;  %v196_v21 = vrot.slane %v952_v17, 2  ;;  %v272_v23 = vrot.slane %v952_v17, 3  ;;  %v961_v24 = vld [vmem:[%s938_s16 + $0x40] sm:$0xff]  ;;  %v1005_v38 = vld [vmem:[%s938_s16 + $0x18] sm:$0xff] }
  0x12   : > { %560 = vmatpush.msrb.mxu1 %v810_v8  ;;  %v206_v15 = vrot.slane %v941_v12, 2  ;;  %845 = vmatpush.msrb.mxu3 %v180_v6  ;;  %v969_v26 = vld [vmem:[%s938_s16 + $0x10] sm:$0xff]  ;;  %v210_v30 = vrot.slane %v961_v24, 2  ;;  %v282_v39 = vrot.slane %v941_v12, 3  ;;  %v284_v40 = vrot.slane %v944_v13, 3  ;;  %v175_v48 = vld [vmem:[%s938_s16 + $0x20] sm:$0xff] }
  0x13   : > { %605 = vmatpush.msrb.mxu2 %v829_v9  ;;  %520 = vmatpush.msrb.mxu0 %v811_v10  ;;  %v974_v27 = vsel %vm348_vm2, %v349_v18, %v350_v20  ;;  %v977_v28 = vsel %vm194_vm0, %v195_v19, %v196_v21  ;;  %v980_v29 = vsel %vm270_vm3, %v271_v22, %v272_v23  ;;  %v352_v31 = vrot.slane %v969_v26, 1  ;;  %v176_v59 = vld [vmem:[%s938_s16 + $0x28] sm:$0xff] }
  0x14   : > { %561 = vmatpush.msrb.mxu1 %v809_v11  ;;  %v966_v25 = vsel %vm194_vm0, %v206_v15, %v208_v16  ;;  %791 = vmatmul.msk.f32.vlgmr.msra.gmra.mxu2 %vm212_vm1, %v974_v27  ;;  %v198_v32 = vrot.slane %v969_v26, 2  ;;  %v274_v33 = vrot.slane %v969_v26, 3  ;;  %v993_v34 = vsel %vm194_vm0, %v208_v16, %v210_v30 }
  0x15   : > { %779 = vmatmul.msk.f32.vlgmr.msra.gmra.mxu3 %vm212_vm1, %v966_v25  ;;  %773 = vmatmul.msk.f32.vlgmr.msra.gmra.mxu0 %vm212_vm1, %v977_v28  ;;  %v996_v35 = vsel %vm348_vm2, %v350_v20, %v352_v31  ;;  %v354_v41 = vrot.slane %v1005_v38, 1  ;;  %v200_v42 = vrot.slane %v1005_v38, 2  ;;  %v276_v43 = vrot.slane %v1005_v38, 3 }
  0x16   : > { %781 = vmatmul.msk.f32.vlgmr.msra.gmra.mxu1 %vm212_vm1, %v980_v29  ;;  %846 = vmatpush.msra.mxu3 %v790_v1  ;;  %v999_v36 = vsel %vm194_vm0, %v196_v21, %v198_v32  ;;  %v1002_v37 = vsel %vm270_vm3, %v272_v23, %v274_v33  ;;  %v1021_v44 = vsel %vm270_vm3, %v282_v39, %v284_v40  ;;  %v286_v50 = vrot.slane %v961_v24, 3 }
  0x17   : > { %v355_v45 = vsel %vm348_vm2, %v352_v31, %v354_v41  ;;  %v201_v46 = vsel %vm194_vm0, %v198_v32, %v200_v42  ;;  %v277_v47 = vsel %vm270_vm3, %v274_v33, %v276_v43  ;;  %v356_v52 = vrot.slane %v175_v48, 1 }
  0x18   : > { %847 = vmatpush.msra.mxu3 %v789_v3  ;;  %v202_v53 = vrot.slane %v175_v48, 2  ;;  %v278_v54 = vrot.slane %v175_v48, 3  ;;  %v287_v55 = vsel %vm270_vm3, %v284_v40, %v286_v50  ;;  %v360_v60 = vrot.slane %v941_v12, 1 }
  0x19   : > { %v357_v56 = vsel %vm348_vm2, %v354_v41, %v356_v52  ;;  %v362_v61 = vrot.slane %v944_v13, 1  ;;  %v358_v62 = vrot.slane %v176_v59, 1  ;;  %v204_v63 = vrot.slane %v176_v59, 2 }
  0x1a   : > { %v203_v57 = vsel %vm194_vm0, %v200_v42, %v202_v53  ;;  %v279_v58 = vsel %vm270_vm3, %v276_v43, %v278_v54  ;;  %v280_v0 = vrot.slane %v176_v59, 3  ;;  %v364_v5 = vrot.slane %v961_v24, 1 }
  0x1b   : > { %v363_v1 = vsel %vm348_vm2, %v360_v60, %v362_v61  ;;  %v359_v2 = vsel %vm348_vm2, %v356_v52, %v358_v62  ;;  %v205_v3 = vsel %vm194_vm0, %v202_v53, %v204_v63  ;;  %v361_v7 = vsel %vm348_vm2, %v358_v62, %v360_v60 }
  0x1c   : > { %792 = vmatmul.msk.f32.gmra.mxu2 %vm212_vm1, %v996_v35  ;;  %v281_v4 = vsel %vm270_vm3, %v278_v54, %v280_v0  ;;  %v365_v6 = vsel %vm348_vm2, %v362_v61, %v364_v5  ;;  %v207_v8 = vsel %vm194_vm0, %v204_v63, %v206_v15  ;;  %v283_v9 = vsel %vm270_vm3, %v280_v0, %v282_v39 }
  0x1d   : > { %780 = vmatmul.msk.f32.gmra.mxu3 %vm212_vm1, %v993_v34  ;;  %774 = vmatmul.msk.f32.gmra.mxu0 %vm212_vm1, %v999_v36 }
  0x1e   : > { %782 = vmatmul.msk.f32.gmra.mxu1 %vm212_vm1, %v1002_v37 }
  0x24   : > { %793 = vmatmul.msk.f32.gmra.mxu2 %vm212_vm1, %v355_v45 }
  0x25   : > { %787 = vmatmul.msk.f32.vlgmr.msrb.gmra.mxu3 %vm212_vm1, %v1021_v44  ;;  %775 = vmatmul.msk.f32.gmra.mxu0 %vm212_vm1, %v201_v46 }
  0x26   : > { %783 = vmatmul.msk.f32.gmra.mxu1 %vm212_vm1, %v277_v47  ;;  %464 = vmatpush.msrb.mxu3 %v800_v49 }
  0x28   : > { %465 = vmatpush.msrb.mxu3 %v799_v51 }
  0x2c   : > { %794 = vmatmul.msk.f32.gmra.mxu2 %vm212_vm1, %v357_v56 }
  0x2d   : > { %788 = vmatmul.msk.f32.gmra.mxu3 %vm212_vm1, %v287_v55  ;;  %776 = vmatmul.msk.f32.gmra.mxu0 %vm212_vm1, %v203_v57 }
  0x2e   : > { %784 = vmatmul.msk.f32.gmra.mxu1 %vm212_vm1, %v279_v58 }
  0x34   : > { %795 = vmatmul.msk.f32.gmra.mxu2 %vm212_vm1, %v359_v2 }
  0x35   : > { %797 = vmatmul.msk.f32.vlgmr.msra.gmra.mxu3 %vm212_vm1, %v363_v1  ;;  %777 = vmatmul.msk.f32.gmra.mxu0 %vm212_vm1, %v205_v3 }
  0x36   : > { %785 = vmatmul.msk.f32.gmra.mxu1 %vm212_vm1, %v281_v4 }
  0x3c   : > { %796 = vmatmul.msk.f32.gmra.mxu2 %vm212_vm1, %v361_v7 }
  0x3d   : > { %798 = vmatmul.msk.f32.gmra.mxu3 %vm212_vm1, %v365_v6  ;;  %778 = vmatmul.msk.f32.gmra.mxu0 %vm212_vm1, %v207_v8 }
  0x3e   : > { %786 = vmatmul.msk.f32.gmra.mxu1 %vm212_vm1, %v283_v9 }
  0x44   : > { %831 = vmatmul.msk.f32.vlgmr.msrb.gmra.mxu2 %vm212_vm1, %v974_v27 }
  0x45   : > { %801 = vmatmul.msk.f32.vlgmr.msrb.gmra.mxu3 %vm212_vm1, %v947_v14  ;;  %813 = vmatmul.msk.f32.vlgmr.msrb.gmra.mxu0 %vm212_vm1, %v977_v28 }
  0x46   : > { %821 = vmatmul.msk.f32.vlgmr.msrb.gmra.mxu1 %vm212_vm1, %v980_v29 }
  0x4c   : > { %832 = vmatmul.msk.f32.gmra.mxu2 %vm212_vm1, %v996_v35 }
  0x4d   : > { %802 = vmatmul.msk.f32.gmra.mxu3 %vm212_vm1, %v952_v17  ;;  %814 = vmatmul.msk.f32.gmra.mxu0 %vm212_vm1, %v999_v36 }
  0x4e   : > { %822 = vmatmul.msk.f32.gmra.mxu1 %vm212_vm1, %v1002_v37 }
  0x54   : > { %833 = vmatmul.msk.f32.gmra.mxu2 %vm212_vm1, %v355_v45 }
  0x55   : > { %803 = vmatmul.msk.f32.gmra.mxu3 %vm212_vm1, %v969_v26  ;;  %815 = vmatmul.msk.f32.gmra.mxu0 %vm212_vm1, %v201_v46 }
  0x56   : > { %823 = vmatmul.msk.f32.gmra.mxu1 %vm212_vm1, %v277_v47 }
  0x5c   : > { %834 = vmatmul.msk.f32.gmra.mxu2 %vm212_vm1, %v357_v56 }
  0x5d   : > { %804 = vmatmul.msk.f32.gmra.mxu3 %vm212_vm1, %v1005_v38  ;;  %816 = vmatmul.msk.f32.gmra.mxu0 %vm212_vm1, %v203_v57 }
  0x5e   : > { %824 = vmatmul.msk.f32.gmra.mxu1 %vm212_vm1, %v279_v58 }
  0x64   : > { %835 = vmatmul.msk.f32.gmra.mxu2 %vm212_vm1, %v359_v2 }
  0x65   : > { %805 = vmatmul.msk.f32.gmra.mxu3 %vm212_vm1, %v175_v48  ;;  %817 = vmatmul.msk.f32.gmra.mxu0 %vm212_vm1, %v205_v3 }
  0x66   : > { %825 = vmatmul.msk.f32.gmra.mxu1 %vm212_vm1, %v281_v4 }
  0x6c   : > { %836 = vmatmul.msk.f32.gmra.mxu2 %vm212_vm1, %v361_v7 }
  0x6d   : > { %806 = vmatmul.msk.f32.gmra.mxu3 %vm212_vm1, %v176_v59  ;;  %818 = vmatmul.msk.f32.gmra.mxu0 %vm212_vm1, %v207_v8 }
  0x6e   : > { %826 = vmatmul.msk.f32.gmra.mxu1 %vm212_vm1, %v283_v9 }
  0x74   : > { %837 = vmatmul.msk.f32.gmra.mxu2 %vm212_vm1, %v363_v1 }
  0x75   : > { %807 = vmatmul.msk.f32.gmra.mxu3 %vm212_vm1, %v941_v12  ;;  %819 = vmatmul.msk.f32.gmra.mxu0 %vm212_vm1, %v966_v25 }
  0x76   : > { %827 = vmatmul.msk.f32.gmra.mxu1 %vm212_vm1, %v1021_v44 }
  0x7c   : > { %838 = vmatmul.msk.f32.gmra.mxu2 %vm212_vm1, %v365_v6 }
  0x7d   : > { %808 = vmatmul.msk.f32.gmra.mxu3 %vm212_vm1, %v944_v13  ;;  %820 = vmatmul.msk.f32.gmra.mxu0 %vm212_vm1, %v993_v34 }
  0x7e   : > { %828 = vmatmul.msk.f32.gmra.mxu1 %vm212_vm1, %v287_v55 }
  0x92   : > { %v246_v10 = vpop.f32.mrf.mxu0 }
  0x93   : > { %v321_v11 = vpop.f32.mrf.mxu1 }
  0x94   : > { %v322_v12 = vadd.f32 %v321_v11, %v246_v10 }
  0x97   : > { %v399_v15 = vpop.f32.mrf.mxu2 }
  0x98   : > { %v264_v14 = vpop.f32.mrf.mxu3  ;;  %v1116_v16 = vadd.f32 %v399_v15, %v322_v12 }
  0x9a   : > { %v249_v17 = vpop.f32.mrf.mxu0 }
  0x9b   : > { %v324_v18 = vpop.f32.mrf.mxu1 }
  0x9c   : > { %v325_v19 = vadd.f32 %v324_v18, %v249_v17 }
  0x9f   : > { %v402_v21 = vpop.f32.mrf.mxu2 }
  0xa0   : > { %v267_v20 = vpop.f32.mrf.mxu3  ;;  %v1118_v13 = vadd.f32 %v402_v21, %v325_v19 }
  0xa2   : > { %v252_v22 = vpop.f32.mrf.mxu0 }
  0xa3   : > { %v327_v23 = vpop.f32.mrf.mxu1 }
  0xa4   : > { %v328_v24 = vadd.f32 %v327_v23, %v252_v22 }
  0xa7   : > { %v405_v27 = vpop.f32.mrf.mxu2 }
  0xa8   : > { %v339_v25 = vpop.f32.mrf.mxu3  ;;  %v1120_v28 = vadd.f32 %v405_v27, %v328_v24 }
  0xa9   : > { %v340_v26 = vadd.f32 %v339_v25, %v264_v14 }
  0xaa   : > { %v255_v29 = vpop.f32.mrf.mxu0 }
  0xab   : > { %v330_v30 = vpop.f32.mrf.mxu1 }
  0xac   : > { %v331_v31 = vadd.f32 %v330_v30, %v255_v29 }
  0xaf   : > { %v408_v34 = vpop.f32.mrf.mxu2 }
  0xb0   : > { %v342_v32 = vpop.f32.mrf.mxu3  ;;  %v1122_v35 = vadd.f32 %v408_v34, %v331_v31 }
  0xb1   : > { %v343_v33 = vadd.f32 %v342_v32, %v267_v20 }
  0xb2   : > { %v258_v36 = vpop.f32.mrf.mxu0 }
  0xb3   : > { %v333_v37 = vpop.f32.mrf.mxu1 }
  0xb4   : > { %v334_v38 = vadd.f32 %v333_v37, %v258_v36 }
  0xb7   : > { %v411_v40 = vpop.f32.mrf.mxu2 }
  0xb8   : > { %v417_v39 = vpop.f32.mrf.mxu3  ;;  %v1126_v42 = vadd.f32 %v411_v40, %v334_v38 }
  0xb9   : > { %v1124_v41 = vadd.f32 %v417_v39, %v340_v26 }
  0xba   : > { %v261_v43 = vpop.f32.mrf.mxu0 }
  0xbb   : > { %v336_v44 = vpop.f32.mrf.mxu1 }
  0xbc   : > { %v337_v45 = vadd.f32 %v336_v44, %v261_v43 }
  0xbf   : > { %v414_v47 = vpop.f32.mrf.mxu2 }
  0xc0   : > { %v420_v46 = vpop.f32.mrf.mxu3  ;;  %v1130_v49 = vadd.f32 %v414_v47, %v337_v45 }
  0xc1   : > { %v1128_v48 = vadd.f32 %v420_v46, %v343_v33  ;;  %v858_v33 = vld [vmem:[%s1186_s2] ss:$0 sm:$0xff] }
  0xc2   : > { %v522_v50 = vpop.f32.mrf.mxu0 }
  0xc3   : > { %v563_v51 = vpop.f32.mrf.mxu1 }
  0xc4   : > { %v564_v52 = vadd.f32 %v563_v51, %v522_v50 }
  0xc7   : > { %v607_v53 = vpop.f32.mrf.mxu2 }
  0xc8   : > { %v631_v54 = vadd.f32 %v607_v53, %v564_v52  ;;  %v467_v29 = vpop.f32.mrf.mxu3 }
  0xc9   : > { %v491_v34 = vadd.f32 %v467_v29, %v1116_v16 }
  0xca   : > { %v525_v55 = vpop.f32.mrf.mxu0  ;;  %647 = vrot.lane.b32.xlu0 %v631_v54, %s867_s21 }
  0xcb   : > { %v566_v56 = vpop.f32.mrf.mxu1 }
  0xcc   : > { %v567_v57 = vadd.f32 %v566_v56, %v525_v55 }
  0xcf   : > { %v610_v58 = vpop.f32.mrf.mxu2 }
  0xd0   : > { %v632_v59 = vadd.f32 %v610_v58, %v567_v57  ;;  %v470_v30 = vpop.f32.mrf.mxu3 }
  0xd1   : > { %v492_v43 = vadd.f32 %v470_v30, %v1118_v13 }
  0xd2   : > { %v528_v60 = vpop.f32.mrf.mxu0  ;;  %649 = vrot.lane.b32.xlu0 %v632_v59, %s867_s21 }
  0xd3   : > { %v569_v61 = vpop.f32.mrf.mxu1 }
  0xd4   : > { %v570_v62 = vadd.f32 %v569_v61, %v528_v60 }
  0xd7   : > { %v613_v63 = vpop.f32.mrf.mxu2 }
  0xd8   : > { %v633_v0 = vadd.f32 %v613_v63, %v570_v62  ;;  %v473_v31 = vpop.f32.mrf.mxu3 }
  0xd9   : > { %v493_v55 = vadd.f32 %v473_v31, %v1120_v28 }
  0xda   : > { %v531_v1 = vpop.f32.mrf.mxu0  ;;  %651 = vrot.lane.b32.xlu1 %v633_v0, %s867_s21 }
  0xdb   : > { %v572_v2 = vpop.f32.mrf.mxu1 }
  0xdc   : > { %v573_v3 = vadd.f32 %v572_v2, %v531_v1 }
  0xdf   : > { %v616_v4 = vpop.f32.mrf.mxu2 }
  0xe0   : > { %v634_v5 = vadd.f32 %v616_v4, %v573_v3  ;;  %v476_v32 = vpop.f32.mrf.mxu3 }
  0xe1   : > { %v494_v28 = vadd.f32 %v476_v32, %v1122_v35 }
  0xe2   : > { %v534_v6 = vpop.f32.mrf.mxu0  ;;  %653 = vrot.lane.b32.xlu1 %v634_v5, %s867_s21 }
  0xe3   : > { %v575_v7 = vpop.f32.mrf.mxu1 }
  0xe4   : > { %v576_v8 = vadd.f32 %v575_v7, %v534_v6 }
  0xe7   : > { %v619_v9 = vpop.f32.mrf.mxu2 }
  0xe8   : > { %v635_v10 = vadd.f32 %v619_v9, %v576_v8  ;;  %v479_v38 = vpop.f32.mrf.mxu3 }
  0xe9   : > { %v495_v16 = vadd.f32 %v479_v38, %v1126_v42 }
  0xea   : > { %v537_v11 = vpop.f32.mrf.mxu0  ;;  %655 = vrot.lane.b32.xlu2 %v635_v10, %s867_s21 }
  0xeb   : > { %v578_v12 = vpop.f32.mrf.mxu1 }
  0xec   : > { %v579_v14 = vadd.f32 %v578_v12, %v537_v11 }
  0xef   : > { %v622_v15 = vpop.f32.mrf.mxu2 }
  0xf0   : > { %v636_v17 = vadd.f32 %v622_v15, %v579_v14  ;;  %v482_v52 = vpop.f32.mrf.mxu3 }
  0xf1   : > { %v496_v13 = vadd.f32 %v482_v52, %v1130_v49 }
  0xf2   : > { %v540_v18 = vpop.f32.mrf.mxu0  ;;  %657 = vrot.lane.b32.xlu2 %v636_v17, %s867_s21 }
  0xf3   : > { %v581_v19 = vpop.f32.mrf.mxu1 }
  0xf4   : > { %v582_v20 = vadd.f32 %v581_v19, %v540_v18 }
  0xf7   : > { %v625_v21 = vpop.f32.mrf.mxu2 }
  0xf8   : > { %v637_v22 = vadd.f32 %v625_v21, %v582_v20  ;;  %v485_v2 = vpop.f32.mrf.mxu3 }
  0xf9   : > { %v497_v3 = vadd.f32 %v485_v2, %v1124_v41 }
  0xfa   : > { %v543_v23 = vpop.f32.mrf.mxu0  ;;  %659 = vrot.lane.b32.xlu0 %v637_v22, %s867_s21 }
  0xfb   : > { %v584_v24 = vpop.f32.mrf.mxu1 }
  0xfc   : > { %v585_v25 = vadd.f32 %v584_v24, %v543_v23 }
  0xff   : > { %v628_v26 = vpop.f32.mrf.mxu2 }
 0x100   : > { %v638_v27 = vadd.f32 %v628_v26, %v585_v25  ;;  %v488_v7 = vpop.f32.mrf.mxu3 }
 0x101   : > { %v498_v35 = vadd.f32 %v488_v7, %v1128_v48 }
 0x102   : > { %661 = vrot.lane.b32.xlu1 %v638_v27, %s867_s21 }
 0x13c   : > { %v648_v36 = vpop.permute.xlu0 %647 }
 0x13d   : > { %v672_v37 = vsel %vm671_vm4, %v491_v34, %v648_v36 }
 0x13e   : > { %v684_v39 = vadd.f32 %v858_v33, %v672_v37 }
 0x140   : > { %v692_v40 = vmax.f32 %v684_v39, 0.0 }
 0x142   : > { %700 = vst.msk [vmem:[%s1149_s27] sm:$0xff] %vm212_vm1, %v692_v40 }
 0x144   : > { %v650_v44 = vpop.permute.xlu0 %649  ;;  %v656_v45 = vpop.permute.xlu2 %655 }
 0x145   : > { %v673_v46 = vsel %vm671_vm4, %v492_v43, %v650_v44  ;;  %v676_v47 = vsel %vm671_vm4, %v495_v16, %v656_v45 }
 0x146   : > { %v685_v50 = vadd.f32 %v858_v33, %v673_v46  ;;  %v688_v51 = vadd.f32 %v858_v33, %v676_v47 }
 0x148   : > { %v693_v53 = vmax.f32 %v685_v50, 0.0  ;;  %v696_v54 = vmax.f32 %v688_v51, 0.0 }
 0x14a   : > { %701 = vst.msk [vmem:[%s1149_s27 + $0x8] sm:$0xff] %vm212_vm1, %v693_v53 }
 0x14b   : > { %704 = vst.msk [vmem:[%s1149_s27 + $0x20] sm:$0xff] %vm212_vm1, %v696_v54 }
 0x14c   : > { %v652_v42 = vpop.permute.xlu1 %651  ;;  %v658_v56 = vpop.permute.xlu2 %657 }
 0x14d   : > { %v674_v57 = vsel %vm671_vm4, %v493_v55, %v652_v42  ;;  %v677_v58 = vsel %vm671_vm4, %v496_v13, %v658_v56 }
 0x14e   : > { %v686_v59 = vadd.f32 %v858_v33, %v674_v57  ;;  %v689_v60 = vadd.f32 %v858_v33, %v677_v58 }
 0x150   : > { %v694_v61 = vmax.f32 %v686_v59, 0.0  ;;  %v697_v62 = vmax.f32 %v689_v60, 0.0 }
 0x152   : > { %702 = vst.msk [vmem:[%s1149_s27 + $0x10] sm:$0xff] %vm212_vm1, %v694_v61 }
 0x153   : > { %705 = vst.msk [vmem:[%s1149_s27 + $0x28] sm:$0xff] %vm212_vm1, %v697_v62 }
 0x154   : > { %v654_v49 = vpop.permute.xlu1 %653 }
 0x155   : > { %v675_v63 = vsel %vm671_vm4, %v494_v28, %v654_v49 }
 0x156   : > { %v687_v0 = vadd.f32 %v858_v33, %v675_v63 }
 0x158   : > { %v695_v1 = vmax.f32 %v687_v0, 0.0 }
 0x15a   : > { %703 = vst.msk [vmem:[%s1149_s27 + $0x18] sm:$0xff] %vm212_vm1, %v695_v1 }
 0x16c   : > { %v660_v4 = vpop.permute.xlu0 %659 }
 0x16d   : > { %v678_v5 = vsel %vm671_vm4, %v497_v3, %v660_v4 }
 0x16e   : > { %v690_v6 = vadd.f32 %v858_v33, %v678_v5 }
 0x170   : > { %v698_v8 = vmax.f32 %v690_v6, 0.0 }
 0x172   : > { %706 = vst.msk [vmem:[%s1149_s27 + $0x30] sm:$0xff] %vm212_vm1, %v698_v8 }
 0x174   : > { %v662_v9 = vpop.permute.xlu1 %661 }
 0x175   : > { %v679_v10 = vsel %vm671_vm4, %v498_v35, %v662_v9 }
 0x176   : > { %v691_v11 = vadd.f32 %v858_v33, %v679_v10 }
 0x178   : > { %v699_v12 = vmax.f32 %v691_v11, 0.0 }
 0x17a   : > { %707 = vst.msk [vmem:[%s1149_s27 + $0x38] sm:$0xff] %vm212_vm1, %v699_v12 }
 0x17b PF: > { %s13_s12 = sadd.s32 1, %s865_s12  }
 0x17c   : > { %p10_p4 = scmp.ge.s32.totalorder %s13_s12, 4  }
 0x17e   :  { %12 = sbr.rel (!%p10_p4) target bundleno = 1 (0x1), region = 68 }

</bundles_post_ra>
